<compile_context>
chip_gen: v7x
topology: tpu7x:2x2x1
jax: 0.10.0
libtpu: 0.0.40
codegen_flags: <defaults>
</compile_context>

<pallas_src>
import jax
import jax.numpy as jnp
from jax import lax
from jax.experimental import pallas as pl
from jax.experimental.pallas import tpu as pltpu

KERNEL_SIZE = 2
EPS = 1e-5        # nn.BatchNorm1d default eps


def _make_kernel(n_active, C, dl, B, L):
    N = B * L
    inv_n = 1.0 / N

    def kernel(x_ref, w0_ref, w1_ref, bfg_ref, wsr_ref, bsr_ref,
               gam_ref, bet_ref, dead_ref, resid_ref, skip_ref):
        resid = x_ref[...]                              # (C, B*L), lane = b*L + t
        skip = jnp.zeros_like(resid)
        # Within-batch time index per lane; masks keep rolls from leaking
        # across batch boundaries.
        tmod = lax.broadcasted_iota(jnp.int32, (C, N), 1) % L

        # y[b, t] = a[b, t - s], zeros flow in from the left of each segment.
        def shift_right(a, s):
            if s == 0:
                return a
            return jnp.where(tmod >= s, jnp.roll(a, s, axis=1), 0.0)

        # y[b, t] = a[b, t + s], zeros flow in from the right of each segment.
        def shift_left(a, s):
            if s == 0:
                return a
            return jnp.where(tmod < L - s, jnp.roll(a, -s, axis=1), 0.0)

        for i in range(n_active):
            d = 2 ** i
            # Layer 0: padding=1, dilation=1, forward drops the last sample
            #   -> y[t] = W0 @ x[t-1] + W1 @ x[t]
            # Layer i>0: padding=d//2 keeps length
            #   -> y[t] = W0 @ x[t-d/2] + W1 @ x[t+d/2]
            s0, s1 = (1, 0) if i == 0 else (d // 2, d // 2)
            x0 = shift_right(resid, s0)
            x1 = shift_left(resid, s1)
            # Two accumulating MXU matmuls (filter|gate stacked on rows);
            # no sublane-concat temp.
            fg = (jnp.dot(w0_ref[i], x0, preferred_element_type=jnp.float32)
                  + jnp.dot(w1_ref[i], x1, preferred_element_type=jnp.float32)
                  + bfg_ref[i])                         # (2*dl, B*L)
            lo = fg[:dl] * fg[dl:]                      # filter * gate, (dl, B*L)

            # nn.BatchNorm1d, training mode: per-channel stats over
            # (batch, length) == one lane reduction (batch is on lanes),
            # biased variance.
            mean = jnp.sum(lo, axis=1, keepdims=True) * inv_n
            cen = lo - mean
            var = jnp.sum(cen * cen, axis=1, keepdims=True) * inv_n
            lo = cen * lax.rsqrt(var + EPS) * gam_ref[i] + bet_ref[i]

            # Fused skip|resid 1x1 convs: one (2*C, dl) @ (dl, B*L) matmul.
            sr = jnp.dot(wsr_ref[i], lo,
                         preferred_element_type=jnp.float32) + bsr_ref[i]
            skip = skip + sr[:C]
            resid = resid + sr[C:]

        # Statically dead layers' constant contributions (folded at pack time).
        skip_ref[...] = skip + dead_ref[:C]
        resid_ref[...] = resid + dead_ref[C:]

    return kernel


def pack_params(params, length):
    """One-time repacking of PyTorch-layout weights into fused kernel weights.

    Row ordering matches the kernel's (channel, b*L + t) layout:
      conv tap k   wfg{k}[i]: (2*dl, C)   rows = [filter | gate]
      1x1          wsr[i]   : (2*C,  dl)  rows = [skip   | resid]
    Biases / BN affine params are stored as (rows, 1) so they broadcast over
    lanes with no in-kernel relayout.  Layers whose dilation exceeds the
    sequence (dilation//2 >= length) see only zero padding; in training-mode BN
    their output is exactly beta, so their skip/resid contribution is a
    constant and is folded into dead_sr.  Assumes res_channels == dl_channels
    (required by the module's BatchNorm) and the module's doubling dilation
    schedule (dead layers form a suffix).
    """
    layers, dl = params['bf'].shape
    C = params['br'].shape[1]
    dead_start = layers
    for i in range(1, layers):
        if (2 ** i) // 2 >= length:
            dead_start = i
            break
    assert dead_start >= 1, "layer 0 is always active"

    wfg0, wfg1, bfg, wsr, bsr, gam, bet = [], [], [], [], [], [], []
    for i in range(dead_start):
        wfg0.append(jnp.concatenate(
            [params['wf'][i, :, :, 0], params['wg'][i, :, :, 0]], axis=0))
        wfg1.append(jnp.concatenate(
            [params['wf'][i, :, :, 1], params['wg'][i, :, :, 1]], axis=0))
        bfg.append(jnp.concatenate([params['bf'][i], params['bg'][i]])[:, None])
        wsr.append(jnp.concatenate(
            [params['ws'][i, :, :, 0], params['wr'][i, :, :, 0]], axis=0))
        bsr.append(jnp.concatenate([params['bs'][i], params['br'][i]])[:, None])
        gam.append(params['gamma'][i][:, None])
        bet.append(params['beta'][i][:, None])

    dead_sr = jnp.zeros((2 * C, 1), jnp.float32)
    for i in range(dead_start, layers):
        w = jnp.concatenate(
            [params['ws'][i, :, :, 0], params['wr'][i, :, :, 0]], axis=0)
        b = jnp.concatenate([params['bs'][i], params['br'][i]])[:, None]
        dead_sr = dead_sr + w @ params['beta'][i][:, None] + b

    return dict(wfg0=jnp.stack(wfg0), wfg1=jnp.stack(wfg1), bfg=jnp.stack(bfg),
                wsr=jnp.stack(wsr), bsr=jnp.stack(bsr),
                gamma=jnp.stack(gam), beta=jnp.stack(bet), dead_sr=dead_sr)


def bitwise_wavenet_block(x_ncl, packed):
    """x_ncl: (batch, residual channels, length), like the PyTorch module."""
    B, C, L = x_ncl.shape
    n_active, two_dl, _ = packed['wfg0'].shape
    dl = two_dl // 2
    N = B * L
    # Batch folded onto lanes: (B, C, L) -> (C, B*L).  This one-time transpose
    # is negligible next to the kernel.
    x = jnp.transpose(x_ncl, (1, 0, 2)).reshape(C, N)

    vmem = pl.BlockSpec(memory_space=pltpu.MemorySpace.VMEM)
    resid, skip = pl.pallas_call(
        _make_kernel(n_active, C, dl, B, L),
        out_shape=(jax.ShapeDtypeStruct((C, N), jnp.float32),
                   jax.ShapeDtypeStruct((C, N), jnp.float32)),
        in_specs=[vmem] * 9,
        out_specs=(vmem, vmem),
        input_output_aliases={0: 0},   # x's buffer is reused for resid
    )(x, packed['wfg0'], packed['wfg1'], packed['bfg'], packed['wsr'],
      packed['bsr'], packed['gamma'], packed['beta'], packed['dead_sr'])

    def unfold(a):
        return a.reshape(C, B, L).transpose(1, 0, 2)

    return unfold(resid), unfold(skip)


def init_params(key, layers, res_channels, dl_channels, kernel_size=KERNEL_SIZE):
    ks = jax.random.split(key, 10)

    def conv_w(k, cout, cin, ksize):
        return 0.3 * jax.random.normal(k, (layers, cout, cin, ksize), jnp.float32)

    return dict(
        wf=conv_w(ks[0], dl_channels, res_channels, kernel_size),
        bf=0.1 * jax.random.normal(ks[1], (layers, dl_channels), jnp.float32),
        wg=conv_w(ks[2], dl_channels, res_channels, kernel_size),
        bg=0.1 * jax.random.normal(ks[3], (layers, dl_channels), jnp.float32),
        wr=conv_w(ks[4], res_channels, dl_channels, 1),
        br=0.1 * jax.random.normal(ks[5], (layers, res_channels), jnp.float32),
        ws=conv_w(ks[6], res_channels, dl_channels, 1),
        bs=0.1 * jax.random.normal(ks[7], (layers, res_channels), jnp.float32),
        gamma=1.0 + 0.1 * jax.random.normal(ks[8], (layers, res_channels), jnp.float32),
        beta=0.1 * jax.random.normal(ks[9], (layers, res_channels), jnp.float32),
    )


def reference_forward(x, params, layers):
    """Pure-JAX reference matching the PyTorch forward (NCL layout)."""
    resid = x
    skip = jnp.zeros_like(x)

    def conv1d(inp, w, b, pad, dil):
        y = lax.conv_general_dilated(inp, w, window_strides=(1,),
                                     padding=[(pad, pad)], rhs_dilation=(dil,),
                                     dimension_numbers=('NCH', 'OIH', 'NCH'))
        return y + b[None, :, None]

    for i in range(layers):
        d = 2 ** i
        p = 1 if i == 0 else d * (KERNEL_SIZE - 1) // 2
        filtered = conv1d(resid, params['wf'][i], params['bf'][i], p, d)
        gated = conv1d(resid, params['wg'][i], params['bg'][i], p, d)
        if i == 0:
            filtered = filtered[:, :, :-1]
            gated = gated[:, :, :-1]
        layer_out = filtered * gated
        mean = jnp.mean(layer_out, axis=(0, 2), keepdims=True)
        var = jnp.mean((layer_out - mean) ** 2, axis=(0, 2), keepdims=True)
        layer_out = (layer_out - mean) * lax.rsqrt(var + EPS)
        layer_out = (layer_out * params['gamma'][i][None, :, None]
                     + params['beta'][i][None, :, None])
        skip = skip + conv1d(layer_out, params['ws'][i], params['bs'][i], 0, 1)
        resid = resid + conv1d(layer_out, params['wr'][i], params['br'][i], 0, 1)
    return resid, skip


if __name__ == "__main__":
    key = jax.random.PRNGKey(0)
    kx, kp = jax.random.split(key)
    # batch, res_channels (= dl_channels), length.  B*L = 128 -> lane-dense
    # activations/stores.  layers=10 is the module default; layers 7..9 have
    # dilation//2 >= L and are folded to constants at pack time.
    B, C, L = 2, 8, 64
    LAYERS = 10
    x = jax.random.normal(kx, (B, C, L), jnp.float32)
    params = init_params(kp, LAYERS, C, C)

    # One-time weight repacking, hoisted out of the forward path.
    packed = pack_params(params, L)

    fwd = jax.jit(bitwise_wavenet_block)
    resid, skip = jax.block_until_ready(fwd(x, packed))

    r_ref, s_ref = reference_forward(x, params, LAYERS)
    assert jnp.allclose(resid, r_ref, atol=2e-3, rtol=2e-3), "resid mismatch"
    assert jnp.allclose(skip, s_ref, atol=2e-3, rtol=2e-3), "skip mismatch"
    print("KERNEL_OK")
</pallas_src>

<mosaic_0001>
module attributes {stable_mosaic.version = 11 : i64} {
  func.func @kernel(%arg0: memref<8x128xf32, #tpu.memory_space<vmem>>, %arg1: memref<7x16x8xf32, #tpu.memory_space<vmem>>, %arg2: memref<7x16x8xf32, #tpu.memory_space<vmem>>, %arg3: memref<7x16x1xf32, #tpu.memory_space<vmem>>, %arg4: memref<7x16x8xf32, #tpu.memory_space<vmem>>, %arg5: memref<7x16x1xf32, #tpu.memory_space<vmem>>, %arg6: memref<7x8x1xf32, #tpu.memory_space<vmem>>, %arg7: memref<7x8x1xf32, #tpu.memory_space<vmem>>, %arg8: memref<16x1xf32, #tpu.memory_space<vmem>>, %arg9: memref<8x128xf32, #tpu.memory_space<vmem>>, %arg10: memref<8x128xf32, #tpu.memory_space<vmem>>) attributes {dimension_semantics = [], scalar_prefetch = 0 : i64, scratch_operands = 0 : i64, tpu.core_type = #tpu.core_type<tc>} {
    %c0 = arith.constant 0 : index
    %c0_0 = arith.constant 0 : index
    %0 = vector.load %arg0[%c0, %c0_0] : memref<8x128xf32, #tpu.memory_space<vmem>>, vector<8x128xf32>
    %cst = arith.constant 0.000000e+00 : f32
    %1 = vector.broadcast %cst : f32 to vector<8x128xf32>
    %2 = tpu.iota {dimensions = array<i32: 1>} : vector<8x128xi32>
    %c64_i32 = arith.constant 64 : i32
    %c0_i32 = arith.constant 0 : i32
    %3 = arith.cmpi eq, %c64_i32, %c0_i32 : i32
    %c1_i32 = arith.constant 1 : i32
    %4 = arith.select %3, %c1_i32, %c64_i32 : i32
    %5 = vector.broadcast %4 : i32 to vector<8x128xi32>
    %6 = arith.remsi %2, %5 : vector<8x128xi32>
    %c0_i32_1 = arith.constant 0 : i32
    %7 = vector.broadcast %c0_i32_1 : i32 to vector<8x128xi32>
    %8 = arith.cmpi ne, %6, %7 : vector<8x128xi32>
    %c0_i32_2 = arith.constant 0 : i32
    %9 = vector.broadcast %c0_i32_2 : i32 to vector<8x128xi32>
    %10 = arith.cmpi slt, %6, %9 : vector<8x128xi32>
    %c0_i32_3 = arith.constant 0 : i32
    %11 = arith.cmpi slt, %4, %c0_i32_3 : i32
    %12 = vector.broadcast %11 : i1 to vector<8x128xi1>
    %13 = vector.broadcast %12 : vector<8x128xi1> to vector<8x128xi1>
    %14 = arith.xori %10, %13 : vector<8x128xi1>
    %15 = arith.andi %14, %8 : vector<8x128xi1>
    %16 = vector.broadcast %4 : i32 to vector<8x128xi32>
    %17 = arith.addi %6, %16 : vector<8x128xi32>
    %18 = arith.select %15, %17, %6 : vector<8x128xi1>, vector<8x128xi32>
    %c1_i32_4 = arith.constant 1 : i32
    %19 = vector.broadcast %c1_i32_4 : i32 to vector<8x128xi32>
    %20 = arith.cmpi sge, %18, %19 : vector<8x128xi32>
    %21 = vector.extract_strided_slice %0 {offsets = [0, 127], sizes = [8, 1], strides = [1, 1]} : vector<8x128xf32> to vector<8x1xf32>
    %22 = vector.extract_strided_slice %0 {offsets = [0, 0], sizes = [8, 127], strides = [1, 1]} : vector<8x128xf32> to vector<8x127xf32>
    %23 = tpu.concatenate %21, %22 in 1 : vector<8x1xf32>, vector<8x127xf32> -> vector<8x128xf32>
    %cst_5 = arith.constant 0.000000e+00 : f32
    %24 = vector.broadcast %cst_5 : f32 to vector<8x128xf32>
    %25 = arith.select %20, %23, %24 : vector<8x128xi1>, vector<8x128xf32>
    %c0_6 = arith.constant 0 : index
    %c0_7 = arith.constant 0 : index
    %c0_8 = arith.constant 0 : index
    %26 = vector.load %arg1[%c0_6, %c0_7, %c0_8] : memref<7x16x8xf32, #tpu.memory_space<vmem>>, vector<1x16x8xf32>
    %27 = vector.shape_cast %26 : vector<1x16x8xf32> to vector<16x8xf32>
    %cst_9 = arith.constant dense<0.000000e+00> : vector<16x128xf32>
    %28 = tpu.matmul %27, %25, %cst_9 {dimension_numbers = #tpu.dot_dimension_numbers<[1], [0], [0], [1], [0, 0, 1, 1], [], []>} : vector<16x8xf32>, vector<8x128xf32>, vector<16x128xf32> -> vector<16x128xf32>
    %c0_10 = arith.constant 0 : index
    %c0_11 = arith.constant 0 : index
    %c0_12 = arith.constant 0 : index
    %29 = vector.load %arg2[%c0_10, %c0_11, %c0_12] : memref<7x16x8xf32, #tpu.memory_space<vmem>>, vector<1x16x8xf32>
    %30 = vector.shape_cast %29 : vector<1x16x8xf32> to vector<16x8xf32>
    %cst_13 = arith.constant dense<0.000000e+00> : vector<16x128xf32>
    %31 = tpu.matmul %30, %0, %cst_13 {dimension_numbers = #tpu.dot_dimension_numbers<[1], [0], [0], [1], [0, 0, 1, 1], [], []>} : vector<16x8xf32>, vector<8x128xf32>, vector<16x128xf32> -> vector<16x128xf32>
    %32 = arith.addf %28, %31 : vector<16x128xf32>
    %c0_14 = arith.constant 0 : index
    %c0_15 = arith.constant 0 : index
    %c0_16 = arith.constant 0 : index
    %33 = vector.load %arg3[%c0_14, %c0_15, %c0_16] : memref<7x16x1xf32, #tpu.memory_space<vmem>>, vector<1x16x1xf32>
    %34 = vector.shape_cast %33 : vector<1x16x1xf32> to vector<16x1xf32>
    %35 = vector.broadcast %34 : vector<16x1xf32> to vector<16x128xf32>
    %36 = arith.addf %32, %35 : vector<16x128xf32>
    %37 = vector.extract_strided_slice %36 {offsets = [0, 0], sizes = [8, 128], strides = [1, 1]} : vector<16x128xf32> to vector<8x128xf32>
    %38 = vector.extract_strided_slice %36 {offsets = [8, 0], sizes = [8, 128], strides = [1, 1]} : vector<16x128xf32> to vector<8x128xf32>
    %39 = arith.mulf %37, %38 : vector<8x128xf32>
    %cst_17 = arith.constant dense<0.000000e+00> : vector<8xf32>
    %40 = vector.multi_reduction <add>, %39, %cst_17 [1] : vector<8x128xf32> to vector<8xf32>
    %41 = vector.shape_cast %40 : vector<8xf32> to vector<8x1xf32>
    %cst_18 = arith.constant 7.812500e-03 : f32
    %42 = vector.broadcast %cst_18 : f32 to vector<8x1xf32>
    %43 = arith.mulf %41, %42 : vector<8x1xf32>
    %44 = vector.broadcast %43 : vector<8x1xf32> to vector<8x128xf32>
    %45 = arith.subf %39, %44 : vector<8x128xf32>
    %46 = arith.mulf %45, %45 : vector<8x128xf32>
    %cst_19 = arith.constant dense<0.000000e+00> : vector<8xf32>
    %47 = vector.multi_reduction <add>, %46, %cst_19 [1] : vector<8x128xf32> to vector<8xf32>
    %48 = vector.shape_cast %47 : vector<8xf32> to vector<8x1xf32>
    %cst_20 = arith.constant 7.812500e-03 : f32
    %49 = vector.broadcast %cst_20 : f32 to vector<8x1xf32>
    %50 = arith.mulf %48, %49 : vector<8x1xf32>
    %cst_21 = arith.constant 9.99999974E-6 : f32
    %51 = vector.broadcast %cst_21 : f32 to vector<8x1xf32>
    %52 = arith.addf %50, %51 : vector<8x1xf32>
    %53 = math.rsqrt %52 : vector<8x1xf32>
    %54 = vector.broadcast %53 : vector<8x1xf32> to vector<8x128xf32>
    %55 = arith.mulf %45, %54 : vector<8x128xf32>
    %c0_22 = arith.constant 0 : index
    %c0_23 = arith.constant 0 : index
    %c0_24 = arith.constant 0 : index
    %56 = vector.load %arg6[%c0_22, %c0_23, %c0_24] : memref<7x8x1xf32, #tpu.memory_space<vmem>>, vector<1x8x1xf32>
    %57 = vector.shape_cast %56 : vector<1x8x1xf32> to vector<8x1xf32>
    %58 = vector.broadcast %57 : vector<8x1xf32> to vector<8x128xf32>
    %59 = arith.mulf %55, %58 : vector<8x128xf32>
    %c0_25 = arith.constant 0 : index
    %c0_26 = arith.constant 0 : index
    %c0_27 = arith.constant 0 : index
    %60 = vector.load %arg7[%c0_25, %c0_26, %c0_27] : memref<7x8x1xf32, #tpu.memory_space<vmem>>, vector<1x8x1xf32>
    %61 = vector.shape_cast %60 : vector<1x8x1xf32> to vector<8x1xf32>
    %62 = vector.broadcast %61 : vector<8x1xf32> to vector<8x128xf32>
    %63 = arith.addf %59, %62 : vector<8x128xf32>
    %c0_28 = arith.constant 0 : index
    %c0_29 = arith.constant 0 : index
    %c0_30 = arith.constant 0 : index
    %64 = vector.load %arg4[%c0_28, %c0_29, %c0_30] : memref<7x16x8xf32, #tpu.memory_space<vmem>>, vector<1x16x8xf32>
    %65 = vector.shape_cast %64 : vector<1x16x8xf32> to vector<16x8xf32>
    %cst_31 = arith.constant dense<0.000000e+00> : vector<16x128xf32>
    %66 = tpu.matmul %65, %63, %cst_31 {dimension_numbers = #tpu.dot_dimension_numbers<[1], [0], [0], [1], [0, 0, 1, 1], [], []>} : vector<16x8xf32>, vector<8x128xf32>, vector<16x128xf32> -> vector<16x128xf32>
    %c0_32 = arith.constant 0 : index
    %c0_33 = arith.constant 0 : index
    %c0_34 = arith.constant 0 : index
    %67 = vector.load %arg5[%c0_32, %c0_33, %c0_34] : memref<7x16x1xf32, #tpu.memory_space<vmem>>, vector<1x16x1xf32>
    %68 = vector.shape_cast %67 : vector<1x16x1xf32> to vector<16x1xf32>
    %69 = vector.broadcast %68 : vector<16x1xf32> to vector<16x128xf32>
    %70 = arith.addf %66, %69 : vector<16x128xf32>
    %71 = vector.extract_strided_slice %70 {offsets = [0, 0], sizes = [8, 128], strides = [1, 1]} : vector<16x128xf32> to vector<8x128xf32>
    %72 = arith.addf %1, %71 : vector<8x128xf32>
    %73 = vector.extract_strided_slice %70 {offsets = [8, 0], sizes = [8, 128], strides = [1, 1]} : vector<16x128xf32> to vector<8x128xf32>
    %74 = arith.addf %0, %73 : vector<8x128xf32>
    %c1_i32_35 = arith.constant 1 : i32
    %75 = vector.broadcast %c1_i32_35 : i32 to vector<8x128xi32>
    %76 = arith.cmpi sge, %18, %75 : vector<8x128xi32>
    %77 = vector.extract_strided_slice %74 {offsets = [0, 127], sizes = [8, 1], strides = [1, 1]} : vector<8x128xf32> to vector<8x1xf32>
    %78 = vector.extract_strided_slice %74 {offsets = [0, 0], sizes = [8, 127], strides = [1, 1]} : vector<8x128xf32> to vector<8x127xf32>
    %79 = tpu.concatenate %77, %78 in 1 : vector<8x1xf32>, vector<8x127xf32> -> vector<8x128xf32>
    %cst_36 = arith.constant 0.000000e+00 : f32
    %80 = vector.broadcast %cst_36 : f32 to vector<8x128xf32>
    %81 = arith.select %76, %79, %80 : vector<8x128xi1>, vector<8x128xf32>
    %c63_i32 = arith.constant 63 : i32
    %82 = vector.broadcast %c63_i32 : i32 to vector<8x128xi32>
    %83 = arith.cmpi slt, %18, %82 : vector<8x128xi32>
    %84 = vector.extract_strided_slice %74 {offsets = [0, 1], sizes = [8, 127], strides = [1, 1]} : vector<8x128xf32> to vector<8x127xf32>
    %85 = vector.extract_strided_slice %74 {offsets = [0, 0], sizes = [8, 1], strides = [1, 1]} : vector<8x128xf32> to vector<8x1xf32>
    %86 = tpu.concatenate %84, %85 in 1 : vector<8x127xf32>, vector<8x1xf32> -> vector<8x128xf32>
    %cst_37 = arith.constant 0.000000e+00 : f32
    %87 = vector.broadcast %cst_37 : f32 to vector<8x128xf32>
    %88 = arith.select %83, %86, %87 : vector<8x128xi1>, vector<8x128xf32>
    %c1 = arith.constant 1 : index
    %c0_38 = arith.constant 0 : index
    %c0_39 = arith.constant 0 : index
    %89 = vector.load %arg1[%c1, %c0_38, %c0_39] : memref<7x16x8xf32, #tpu.memory_space<vmem>>, vector<1x16x8xf32>
    %90 = vector.shape_cast %89 : vector<1x16x8xf32> to vector<16x8xf32>
    %cst_40 = arith.constant dense<0.000000e+00> : vector<16x128xf32>
    %91 = tpu.matmul %90, %81, %cst_40 {dimension_numbers = #tpu.dot_dimension_numbers<[1], [0], [0], [1], [0, 0, 1, 1], [], []>} : vector<16x8xf32>, vector<8x128xf32>, vector<16x128xf32> -> vector<16x128xf32>
    %c1_41 = arith.constant 1 : index
    %c0_42 = arith.constant 0 : index
    %c0_43 = arith.constant 0 : index
    %92 = vector.load %arg2[%c1_41, %c0_42, %c0_43] : memref<7x16x8xf32, #tpu.memory_space<vmem>>, vector<1x16x8xf32>
    %93 = vector.shape_cast %92 : vector<1x16x8xf32> to vector<16x8xf32>
    %cst_44 = arith.constant dense<0.000000e+00> : vector<16x128xf32>
    %94 = tpu.matmul %93, %88, %cst_44 {dimension_numbers = #tpu.dot_dimension_numbers<[1], [0], [0], [1], [0, 0, 1, 1], [], []>} : vector<16x8xf32>, vector<8x128xf32>, vector<16x128xf32> -> vector<16x128xf32>
    %95 = arith.addf %91, %94 : vector<16x128xf32>
    %c1_45 = arith.constant 1 : index
    %c0_46 = arith.constant 0 : index
    %c0_47 = arith.constant 0 : index
    %96 = vector.load %arg3[%c1_45, %c0_46, %c0_47] : memref<7x16x1xf32, #tpu.memory_space<vmem>>, vector<1x16x1xf32>
    %97 = vector.shape_cast %96 : vector<1x16x1xf32> to vector<16x1xf32>
    %98 = vector.broadcast %97 : vector<16x1xf32> to vector<16x128xf32>
    %99 = arith.addf %95, %98 : vector<16x128xf32>
    %100 = vector.extract_strided_slice %99 {offsets = [0, 0], sizes = [8, 128], strides = [1, 1]} : vector<16x128xf32> to vector<8x128xf32>
    %101 = vector.extract_strided_slice %99 {offsets = [8, 0], sizes = [8, 128], strides = [1, 1]} : vector<16x128xf32> to vector<8x128xf32>
    %102 = arith.mulf %100, %101 : vector<8x128xf32>
    %cst_48 = arith.constant dense<0.000000e+00> : vector<8xf32>
    %103 = vector.multi_reduction <add>, %102, %cst_48 [1] : vector<8x128xf32> to vector<8xf32>
    %104 = vector.shape_cast %103 : vector<8xf32> to vector<8x1xf32>
    %cst_49 = arith.constant 7.812500e-03 : f32
    %105 = vector.broadcast %cst_49 : f32 to vector<8x1xf32>
    %106 = arith.mulf %104, %105 : vector<8x1xf32>
    %107 = vector.broadcast %106 : vector<8x1xf32> to vector<8x128xf32>
    %108 = arith.subf %102, %107 : vector<8x128xf32>
    %109 = arith.mulf %108, %108 : vector<8x128xf32>
    %cst_50 = arith.constant dense<0.000000e+00> : vector<8xf32>
    %110 = vector.multi_reduction <add>, %109, %cst_50 [1] : vector<8x128xf32> to vector<8xf32>
    %111 = vector.shape_cast %110 : vector<8xf32> to vector<8x1xf32>
    %cst_51 = arith.constant 7.812500e-03 : f32
    %112 = vector.broadcast %cst_51 : f32 to vector<8x1xf32>
    %113 = arith.mulf %111, %112 : vector<8x1xf32>
    %cst_52 = arith.constant 9.99999974E-6 : f32
    %114 = vector.broadcast %cst_52 : f32 to vector<8x1xf32>
    %115 = arith.addf %113, %114 : vector<8x1xf32>
    %116 = math.rsqrt %115 : vector<8x1xf32>
    %117 = vector.broadcast %116 : vector<8x1xf32> to vector<8x128xf32>
    %118 = arith.mulf %108, %117 : vector<8x128xf32>
    %c1_53 = arith.constant 1 : index
    %c0_54 = arith.constant 0 : index
    %c0_55 = arith.constant 0 : index
    %119 = vector.load %arg6[%c1_53, %c0_54, %c0_55] : memref<7x8x1xf32, #tpu.memory_space<vmem>>, vector<1x8x1xf32>
    %120 = vector.shape_cast %119 : vector<1x8x1xf32> to vector<8x1xf32>
    %121 = vector.broadcast %120 : vector<8x1xf32> to vector<8x128xf32>
    %122 = arith.mulf %118, %121 : vector<8x128xf32>
    %c1_56 = arith.constant 1 : index
    %c0_57 = arith.constant 0 : index
    %c0_58 = arith.constant 0 : index
    %123 = vector.load %arg7[%c1_56, %c0_57, %c0_58] : memref<7x8x1xf32, #tpu.memory_space<vmem>>, vector<1x8x1xf32>
    %124 = vector.shape_cast %123 : vector<1x8x1xf32> to vector<8x1xf32>
    %125 = vector.broadcast %124 : vector<8x1xf32> to vector<8x128xf32>
    %126 = arith.addf %122, %125 : vector<8x128xf32>
    %c1_59 = arith.constant 1 : index
    %c0_60 = arith.constant 0 : index
    %c0_61 = arith.constant 0 : index
    %127 = vector.load %arg4[%c1_59, %c0_60, %c0_61] : memref<7x16x8xf32, #tpu.memory_space<vmem>>, vector<1x16x8xf32>
    %128 = vector.shape_cast %127 : vector<1x16x8xf32> to vector<16x8xf32>
    %cst_62 = arith.constant dense<0.000000e+00> : vector<16x128xf32>
    %129 = tpu.matmul %128, %126, %cst_62 {dimension_numbers = #tpu.dot_dimension_numbers<[1], [0], [0], [1], [0, 0, 1, 1], [], []>} : vector<16x8xf32>, vector<8x128xf32>, vector<16x128xf32> -> vector<16x128xf32>
    %c1_63 = arith.constant 1 : index
    %c0_64 = arith.constant 0 : index
    %c0_65 = arith.constant 0 : index
    %130 = vector.load %arg5[%c1_63, %c0_64, %c0_65] : memref<7x16x1xf32, #tpu.memory_space<vmem>>, vector<1x16x1xf32>
    %131 = vector.shape_cast %130 : vector<1x16x1xf32> to vector<16x1xf32>
    %132 = vector.broadcast %131 : vector<16x1xf32> to vector<16x128xf32>
    %133 = arith.addf %129, %132 : vector<16x128xf32>
    %134 = vector.extract_strided_slice %133 {offsets = [0, 0], sizes = [8, 128], strides = [1, 1]} : vector<16x128xf32> to vector<8x128xf32>
    %135 = arith.addf %72, %134 : vector<8x128xf32>
    %136 = vector.extract_strided_slice %133 {offsets = [8, 0], sizes = [8, 128], strides = [1, 1]} : vector<16x128xf32> to vector<8x128xf32>
    %137 = arith.addf %74, %136 : vector<8x128xf32>
    %c2_i32 = arith.constant 2 : i32
    %138 = vector.broadcast %c2_i32 : i32 to vector<8x128xi32>
    %139 = arith.cmpi sge, %18, %138 : vector<8x128xi32>
    %140 = vector.extract_strided_slice %137 {offsets = [0, 126], sizes = [8, 2], strides = [1, 1]} : vector<8x128xf32> to vector<8x2xf32>
    %141 = vector.extract_strided_slice %137 {offsets = [0, 0], sizes = [8, 126], strides = [1, 1]} : vector<8x128xf32> to vector<8x126xf32>
    %142 = tpu.concatenate %140, %141 in 1 : vector<8x2xf32>, vector<8x126xf32> -> vector<8x128xf32>
    %cst_66 = arith.constant 0.000000e+00 : f32
    %143 = vector.broadcast %cst_66 : f32 to vector<8x128xf32>
    %144 = arith.select %139, %142, %143 : vector<8x128xi1>, vector<8x128xf32>
    %c62_i32 = arith.constant 62 : i32
    %145 = vector.broadcast %c62_i32 : i32 to vector<8x128xi32>
    %146 = arith.cmpi slt, %18, %145 : vector<8x128xi32>
    %147 = vector.extract_strided_slice %137 {offsets = [0, 2], sizes = [8, 126], strides = [1, 1]} : vector<8x128xf32> to vector<8x126xf32>
    %148 = vector.extract_strided_slice %137 {offsets = [0, 0], sizes = [8, 2], strides = [1, 1]} : vector<8x128xf32> to vector<8x2xf32>
    %149 = tpu.concatenate %147, %148 in 1 : vector<8x126xf32>, vector<8x2xf32> -> vector<8x128xf32>
    %cst_67 = arith.constant 0.000000e+00 : f32
    %150 = vector.broadcast %cst_67 : f32 to vector<8x128xf32>
    %151 = arith.select %146, %149, %150 : vector<8x128xi1>, vector<8x128xf32>
    %c2 = arith.constant 2 : index
    %c0_68 = arith.constant 0 : index
    %c0_69 = arith.constant 0 : index
    %152 = vector.load %arg1[%c2, %c0_68, %c0_69] : memref<7x16x8xf32, #tpu.memory_space<vmem>>, vector<1x16x8xf32>
    %153 = vector.shape_cast %152 : vector<1x16x8xf32> to vector<16x8xf32>
    %cst_70 = arith.constant dense<0.000000e+00> : vector<16x128xf32>
    %154 = tpu.matmul %153, %144, %cst_70 {dimension_numbers = #tpu.dot_dimension_numbers<[1], [0], [0], [1], [0, 0, 1, 1], [], []>} : vector<16x8xf32>, vector<8x128xf32>, vector<16x128xf32> -> vector<16x128xf32>
    %c2_71 = arith.constant 2 : index
    %c0_72 = arith.constant 0 : index
    %c0_73 = arith.constant 0 : index
    %155 = vector.load %arg2[%c2_71, %c0_72, %c0_73] : memref<7x16x8xf32, #tpu.memory_space<vmem>>, vector<1x16x8xf32>
    %156 = vector.shape_cast %155 : vector<1x16x8xf32> to vector<16x8xf32>
    %cst_74 = arith.constant dense<0.000000e+00> : vector<16x128xf32>
    %157 = tpu.matmul %156, %151, %cst_74 {dimension_numbers = #tpu.dot_dimension_numbers<[1], [0], [0], [1], [0, 0, 1, 1], [], []>} : vector<16x8xf32>, vector<8x128xf32>, vector<16x128xf32> -> vector<16x128xf32>
    %158 = arith.addf %154, %157 : vector<16x128xf32>
    %c2_75 = arith.constant 2 : index
    %c0_76 = arith.constant 0 : index
    %c0_77 = arith.constant 0 : index
    %159 = vector.load %arg3[%c2_75, %c0_76, %c0_77] : memref<7x16x1xf32, #tpu.memory_space<vmem>>, vector<1x16x1xf32>
    %160 = vector.shape_cast %159 : vector<1x16x1xf32> to vector<16x1xf32>
    %161 = vector.broadcast %160 : vector<16x1xf32> to vector<16x128xf32>
    %162 = arith.addf %158, %161 : vector<16x128xf32>
    %163 = vector.extract_strided_slice %162 {offsets = [0, 0], sizes = [8, 128], strides = [1, 1]} : vector<16x128xf32> to vector<8x128xf32>
    %164 = vector.extract_strided_slice %162 {offsets = [8, 0], sizes = [8, 128], strides = [1, 1]} : vector<16x128xf32> to vector<8x128xf32>
    %165 = arith.mulf %163, %164 : vector<8x128xf32>
    %cst_78 = arith.constant dense<0.000000e+00> : vector<8xf32>
    %166 = vector.multi_reduction <add>, %165, %cst_78 [1] : vector<8x128xf32> to vector<8xf32>
    %167 = vector.shape_cast %166 : vector<8xf32> to vector<8x1xf32>
    %cst_79 = arith.constant 7.812500e-03 : f32
    %168 = vector.broadcast %cst_79 : f32 to vector<8x1xf32>
    %169 = arith.mulf %167, %168 : vector<8x1xf32>
    %170 = vector.broadcast %169 : vector<8x1xf32> to vector<8x128xf32>
    %171 = arith.subf %165, %170 : vector<8x128xf32>
    %172 = arith.mulf %171, %171 : vector<8x128xf32>
    %cst_80 = arith.constant dense<0.000000e+00> : vector<8xf32>
    %173 = vector.multi_reduction <add>, %172, %cst_80 [1] : vector<8x128xf32> to vector<8xf32>
    %174 = vector.shape_cast %173 : vector<8xf32> to vector<8x1xf32>
    %cst_81 = arith.constant 7.812500e-03 : f32
    %175 = vector.broadcast %cst_81 : f32 to vector<8x1xf32>
    %176 = arith.mulf %174, %175 : vector<8x1xf32>
    %cst_82 = arith.constant 9.99999974E-6 : f32
    %177 = vector.broadcast %cst_82 : f32 to vector<8x1xf32>
    %178 = arith.addf %176, %177 : vector<8x1xf32>
    %179 = math.rsqrt %178 : vector<8x1xf32>
    %180 = vector.broadcast %179 : vector<8x1xf32> to vector<8x128xf32>
    %181 = arith.mulf %171, %180 : vector<8x128xf32>
    %c2_83 = arith.constant 2 : index
    %c0_84 = arith.constant 0 : index
    %c0_85 = arith.constant 0 : index
    %182 = vector.load %arg6[%c2_83, %c0_84, %c0_85] : memref<7x8x1xf32, #tpu.memory_space<vmem>>, vector<1x8x1xf32>
    %183 = vector.shape_cast %182 : vector<1x8x1xf32> to vector<8x1xf32>
    %184 = vector.broadcast %183 : vector<8x1xf32> to vector<8x128xf32>
    %185 = arith.mulf %181, %184 : vector<8x128xf32>
    %c2_86 = arith.constant 2 : index
    %c0_87 = arith.constant 0 : index
    %c0_88 = arith.constant 0 : index
    %186 = vector.load %arg7[%c2_86, %c0_87, %c0_88] : memref<7x8x1xf32, #tpu.memory_space<vmem>>, vector<1x8x1xf32>
    %187 = vector.shape_cast %186 : vector<1x8x1xf32> to vector<8x1xf32>
    %188 = vector.broadcast %187 : vector<8x1xf32> to vector<8x128xf32>
    %189 = arith.addf %185, %188 : vector<8x128xf32>
    %c2_89 = arith.constant 2 : index
    %c0_90 = arith.constant 0 : index
    %c0_91 = arith.constant 0 : index
    %190 = vector.load %arg4[%c2_89, %c0_90, %c0_91] : memref<7x16x8xf32, #tpu.memory_space<vmem>>, vector<1x16x8xf32>
    %191 = vector.shape_cast %190 : vector<1x16x8xf32> to vector<16x8xf32>
    %cst_92 = arith.constant dense<0.000000e+00> : vector<16x128xf32>
    %192 = tpu.matmul %191, %189, %cst_92 {dimension_numbers = #tpu.dot_dimension_numbers<[1], [0], [0], [1], [0, 0, 1, 1], [], []>} : vector<16x8xf32>, vector<8x128xf32>, vector<16x128xf32> -> vector<16x128xf32>
    %c2_93 = arith.constant 2 : index
    %c0_94 = arith.constant 0 : index
    %c0_95 = arith.constant 0 : index
    %193 = vector.load %arg5[%c2_93, %c0_94, %c0_95] : memref<7x16x1xf32, #tpu.memory_space<vmem>>, vector<1x16x1xf32>
    %194 = vector.shape_cast %193 : vector<1x16x1xf32> to vector<16x1xf32>
    %195 = vector.broadcast %194 : vector<16x1xf32> to vector<16x128xf32>
    %196 = arith.addf %192, %195 : vector<16x128xf32>
    %197 = vector.extract_strided_slice %196 {offsets = [0, 0], sizes = [8, 128], strides = [1, 1]} : vector<16x128xf32> to vector<8x128xf32>
    %198 = arith.addf %135, %197 : vector<8x128xf32>
    %199 = vector.extract_strided_slice %196 {offsets = [8, 0], sizes = [8, 128], strides = [1, 1]} : vector<16x128xf32> to vector<8x128xf32>
    %200 = arith.addf %137, %199 : vector<8x128xf32>
    %c4_i32 = arith.constant 4 : i32
    %201 = vector.broadcast %c4_i32 : i32 to vector<8x128xi32>
    %202 = arith.cmpi sge, %18, %201 : vector<8x128xi32>
    %203 = vector.extract_strided_slice %200 {offsets = [0, 124], sizes = [8, 4], strides = [1, 1]} : vector<8x128xf32> to vector<8x4xf32>
    %204 = vector.extract_strided_slice %200 {offsets = [0, 0], sizes = [8, 124], strides = [1, 1]} : vector<8x128xf32> to vector<8x124xf32>
    %205 = tpu.concatenate %203, %204 in 1 : vector<8x4xf32>, vector<8x124xf32> -> vector<8x128xf32>
    %cst_96 = arith.constant 0.000000e+00 : f32
    %206 = vector.broadcast %cst_96 : f32 to vector<8x128xf32>
    %207 = arith.select %202, %205, %206 : vector<8x128xi1>, vector<8x128xf32>
    %c60_i32 = arith.constant 60 : i32
    %208 = vector.broadcast %c60_i32 : i32 to vector<8x128xi32>
    %209 = arith.cmpi slt, %18, %208 : vector<8x128xi32>
    %210 = vector.extract_strided_slice %200 {offsets = [0, 4], sizes = [8, 124], strides = [1, 1]} : vector<8x128xf32> to vector<8x124xf32>
    %211 = vector.extract_strided_slice %200 {offsets = [0, 0], sizes = [8, 4], strides = [1, 1]} : vector<8x128xf32> to vector<8x4xf32>
    %212 = tpu.concatenate %210, %211 in 1 : vector<8x124xf32>, vector<8x4xf32> -> vector<8x128xf32>
    %cst_97 = arith.constant 0.000000e+00 : f32
    %213 = vector.broadcast %cst_97 : f32 to vector<8x128xf32>
    %214 = arith.select %209, %212, %213 : vector<8x128xi1>, vector<8x128xf32>
    %c3 = arith.constant 3 : index
    %c0_98 = arith.constant 0 : index
    %c0_99 = arith.constant 0 : index
    %215 = vector.load %arg1[%c3, %c0_98, %c0_99] : memref<7x16x8xf32, #tpu.memory_space<vmem>>, vector<1x16x8xf32>
    %216 = vector.shape_cast %215 : vector<1x16x8xf32> to vector<16x8xf32>
    %cst_100 = arith.constant dense<0.000000e+00> : vector<16x128xf32>
    %217 = tpu.matmul %216, %207, %cst_100 {dimension_numbers = #tpu.dot_dimension_numbers<[1], [0], [0], [1], [0, 0, 1, 1], [], []>} : vector<16x8xf32>, vector<8x128xf32>, vector<16x128xf32> -> vector<16x128xf32>
    %c3_101 = arith.constant 3 : index
    %c0_102 = arith.constant 0 : index
    %c0_103 = arith.constant 0 : index
    %218 = vector.load %arg2[%c3_101, %c0_102, %c0_103] : memref<7x16x8xf32, #tpu.memory_space<vmem>>, vector<1x16x8xf32>
    %219 = vector.shape_cast %218 : vector<1x16x8xf32> to vector<16x8xf32>
    %cst_104 = arith.constant dense<0.000000e+00> : vector<16x128xf32>
    %220 = tpu.matmul %219, %214, %cst_104 {dimension_numbers = #tpu.dot_dimension_numbers<[1], [0], [0], [1], [0, 0, 1, 1], [], []>} : vector<16x8xf32>, vector<8x128xf32>, vector<16x128xf32> -> vector<16x128xf32>
    %221 = arith.addf %217, %220 : vector<16x128xf32>
    %c3_105 = arith.constant 3 : index
    %c0_106 = arith.constant 0 : index
    %c0_107 = arith.constant 0 : index
    %222 = vector.load %arg3[%c3_105, %c0_106, %c0_107] : memref<7x16x1xf32, #tpu.memory_space<vmem>>, vector<1x16x1xf32>
    %223 = vector.shape_cast %222 : vector<1x16x1xf32> to vector<16x1xf32>
    %224 = vector.broadcast %223 : vector<16x1xf32> to vector<16x128xf32>
    %225 = arith.addf %221, %224 : vector<16x128xf32>
    %226 = vector.extract_strided_slice %225 {offsets = [0, 0], sizes = [8, 128], strides = [1, 1]} : vector<16x128xf32> to vector<8x128xf32>
    %227 = vector.extract_strided_slice %225 {offsets = [8, 0], sizes = [8, 128], strides = [1, 1]} : vector<16x128xf32> to vector<8x128xf32>
    %228 = arith.mulf %226, %227 : vector<8x128xf32>
    %cst_108 = arith.constant dense<0.000000e+00> : vector<8xf32>
    %229 = vector.multi_reduction <add>, %228, %cst_108 [1] : vector<8x128xf32> to vector<8xf32>
    %230 = vector.shape_cast %229 : vector<8xf32> to vector<8x1xf32>
    %cst_109 = arith.constant 7.812500e-03 : f32
    %231 = vector.broadcast %cst_109 : f32 to vector<8x1xf32>
    %232 = arith.mulf %230, %231 : vector<8x1xf32>
    %233 = vector.broadcast %232 : vector<8x1xf32> to vector<8x128xf32>
    %234 = arith.subf %228, %233 : vector<8x128xf32>
    %235 = arith.mulf %234, %234 : vector<8x128xf32>
    %cst_110 = arith.constant dense<0.000000e+00> : vector<8xf32>
    %236 = vector.multi_reduction <add>, %235, %cst_110 [1] : vector<8x128xf32> to vector<8xf32>
    %237 = vector.shape_cast %236 : vector<8xf32> to vector<8x1xf32>
    %cst_111 = arith.constant 7.812500e-03 : f32
    %238 = vector.broadcast %cst_111 : f32 to vector<8x1xf32>
    %239 = arith.mulf %237, %238 : vector<8x1xf32>
    %cst_112 = arith.constant 9.99999974E-6 : f32
    %240 = vector.broadcast %cst_112 : f32 to vector<8x1xf32>
    %241 = arith.addf %239, %240 : vector<8x1xf32>
    %242 = math.rsqrt %241 : vector<8x1xf32>
    %243 = vector.broadcast %242 : vector<8x1xf32> to vector<8x128xf32>
    %244 = arith.mulf %234, %243 : vector<8x128xf32>
    %c3_113 = arith.constant 3 : index
    %c0_114 = arith.constant 0 : index
    %c0_115 = arith.constant 0 : index
    %245 = vector.load %arg6[%c3_113, %c0_114, %c0_115] : memref<7x8x1xf32, #tpu.memory_space<vmem>>, vector<1x8x1xf32>
    %246 = vector.shape_cast %245 : vector<1x8x1xf32> to vector<8x1xf32>
    %247 = vector.broadcast %246 : vector<8x1xf32> to vector<8x128xf32>
    %248 = arith.mulf %244, %247 : vector<8x128xf32>
    %c3_116 = arith.constant 3 : index
    %c0_117 = arith.constant 0 : index
    %c0_118 = arith.constant 0 : index
    %249 = vector.load %arg7[%c3_116, %c0_117, %c0_118] : memref<7x8x1xf32, #tpu.memory_space<vmem>>, vector<1x8x1xf32>
    %250 = vector.shape_cast %249 : vector<1x8x1xf32> to vector<8x1xf32>
    %251 = vector.broadcast %250 : vector<8x1xf32> to vector<8x128xf32>
    %252 = arith.addf %248, %251 : vector<8x128xf32>
    %c3_119 = arith.constant 3 : index
    %c0_120 = arith.constant 0 : index
    %c0_121 = arith.constant 0 : index
    %253 = vector.load %arg4[%c3_119, %c0_120, %c0_121] : memref<7x16x8xf32, #tpu.memory_space<vmem>>, vector<1x16x8xf32>
    %254 = vector.shape_cast %253 : vector<1x16x8xf32> to vector<16x8xf32>
    %cst_122 = arith.constant dense<0.000000e+00> : vector<16x128xf32>
    %255 = tpu.matmul %254, %252, %cst_122 {dimension_numbers = #tpu.dot_dimension_numbers<[1], [0], [0], [1], [0, 0, 1, 1], [], []>} : vector<16x8xf32>, vector<8x128xf32>, vector<16x128xf32> -> vector<16x128xf32>
    %c3_123 = arith.constant 3 : index
    %c0_124 = arith.constant 0 : index
    %c0_125 = arith.constant 0 : index
    %256 = vector.load %arg5[%c3_123, %c0_124, %c0_125] : memref<7x16x1xf32, #tpu.memory_space<vmem>>, vector<1x16x1xf32>
    %257 = vector.shape_cast %256 : vector<1x16x1xf32> to vector<16x1xf32>
    %258 = vector.broadcast %257 : vector<16x1xf32> to vector<16x128xf32>
    %259 = arith.addf %255, %258 : vector<16x128xf32>
    %260 = vector.extract_strided_slice %259 {offsets = [0, 0], sizes = [8, 128], strides = [1, 1]} : vector<16x128xf32> to vector<8x128xf32>
    %261 = arith.addf %198, %260 : vector<8x128xf32>
    %262 = vector.extract_strided_slice %259 {offsets = [8, 0], sizes = [8, 128], strides = [1, 1]} : vector<16x128xf32> to vector<8x128xf32>
    %263 = arith.addf %200, %262 : vector<8x128xf32>
    %c8_i32 = arith.constant 8 : i32
    %264 = vector.broadcast %c8_i32 : i32 to vector<8x128xi32>
    %265 = arith.cmpi sge, %18, %264 : vector<8x128xi32>
    %266 = vector.extract_strided_slice %263 {offsets = [0, 120], sizes = [8, 8], strides = [1, 1]} : vector<8x128xf32> to vector<8x8xf32>
    %267 = vector.extract_strided_slice %263 {offsets = [0, 0], sizes = [8, 120], strides = [1, 1]} : vector<8x128xf32> to vector<8x120xf32>
    %268 = tpu.concatenate %266, %267 in 1 : vector<8x8xf32>, vector<8x120xf32> -> vector<8x128xf32>
    %cst_126 = arith.constant 0.000000e+00 : f32
    %269 = vector.broadcast %cst_126 : f32 to vector<8x128xf32>
    %270 = arith.select %265, %268, %269 : vector<8x128xi1>, vector<8x128xf32>
    %c56_i32 = arith.constant 56 : i32
    %271 = vector.broadcast %c56_i32 : i32 to vector<8x128xi32>
    %272 = arith.cmpi slt, %18, %271 : vector<8x128xi32>
    %273 = vector.extract_strided_slice %263 {offsets = [0, 8], sizes = [8, 120], strides = [1, 1]} : vector<8x128xf32> to vector<8x120xf32>
    %274 = vector.extract_strided_slice %263 {offsets = [0, 0], sizes = [8, 8], strides = [1, 1]} : vector<8x128xf32> to vector<8x8xf32>
    %275 = tpu.concatenate %273, %274 in 1 : vector<8x120xf32>, vector<8x8xf32> -> vector<8x128xf32>
    %cst_127 = arith.constant 0.000000e+00 : f32
    %276 = vector.broadcast %cst_127 : f32 to vector<8x128xf32>
    %277 = arith.select %272, %275, %276 : vector<8x128xi1>, vector<8x128xf32>
    %c4 = arith.constant 4 : index
    %c0_128 = arith.constant 0 : index
    %c0_129 = arith.constant 0 : index
    %278 = vector.load %arg1[%c4, %c0_128, %c0_129] : memref<7x16x8xf32, #tpu.memory_space<vmem>>, vector<1x16x8xf32>
    %279 = vector.shape_cast %278 : vector<1x16x8xf32> to vector<16x8xf32>
    %cst_130 = arith.constant dense<0.000000e+00> : vector<16x128xf32>
    %280 = tpu.matmul %279, %270, %cst_130 {dimension_numbers = #tpu.dot_dimension_numbers<[1], [0], [0], [1], [0, 0, 1, 1], [], []>} : vector<16x8xf32>, vector<8x128xf32>, vector<16x128xf32> -> vector<16x128xf32>
    %c4_131 = arith.constant 4 : index
    %c0_132 = arith.constant 0 : index
    %c0_133 = arith.constant 0 : index
    %281 = vector.load %arg2[%c4_131, %c0_132, %c0_133] : memref<7x16x8xf32, #tpu.memory_space<vmem>>, vector<1x16x8xf32>
    %282 = vector.shape_cast %281 : vector<1x16x8xf32> to vector<16x8xf32>
    %cst_134 = arith.constant dense<0.000000e+00> : vector<16x128xf32>
    %283 = tpu.matmul %282, %277, %cst_134 {dimension_numbers = #tpu.dot_dimension_numbers<[1], [0], [0], [1], [0, 0, 1, 1], [], []>} : vector<16x8xf32>, vector<8x128xf32>, vector<16x128xf32> -> vector<16x128xf32>
    %284 = arith.addf %280, %283 : vector<16x128xf32>
    %c4_135 = arith.constant 4 : index
    %c0_136 = arith.constant 0 : index
    %c0_137 = arith.constant 0 : index
    %285 = vector.load %arg3[%c4_135, %c0_136, %c0_137] : memref<7x16x1xf32, #tpu.memory_space<vmem>>, vector<1x16x1xf32>
    %286 = vector.shape_cast %285 : vector<1x16x1xf32> to vector<16x1xf32>
    %287 = vector.broadcast %286 : vector<16x1xf32> to vector<16x128xf32>
    %288 = arith.addf %284, %287 : vector<16x128xf32>
    %289 = vector.extract_strided_slice %288 {offsets = [0, 0], sizes = [8, 128], strides = [1, 1]} : vector<16x128xf32> to vector<8x128xf32>
    %290 = vector.extract_strided_slice %288 {offsets = [8, 0], sizes = [8, 128], strides = [1, 1]} : vector<16x128xf32> to vector<8x128xf32>
    %291 = arith.mulf %289, %290 : vector<8x128xf32>
    %cst_138 = arith.constant dense<0.000000e+00> : vector<8xf32>
    %292 = vector.multi_reduction <add>, %291, %cst_138 [1] : vector<8x128xf32> to vector<8xf32>
    %293 = vector.shape_cast %292 : vector<8xf32> to vector<8x1xf32>
    %cst_139 = arith.constant 7.812500e-03 : f32
    %294 = vector.broadcast %cst_139 : f32 to vector<8x1xf32>
    %295 = arith.mulf %293, %294 : vector<8x1xf32>
    %296 = vector.broadcast %295 : vector<8x1xf32> to vector<8x128xf32>
    %297 = arith.subf %291, %296 : vector<8x128xf32>
    %298 = arith.mulf %297, %297 : vector<8x128xf32>
    %cst_140 = arith.constant dense<0.000000e+00> : vector<8xf32>
    %299 = vector.multi_reduction <add>, %298, %cst_140 [1] : vector<8x128xf32> to vector<8xf32>
    %300 = vector.shape_cast %299 : vector<8xf32> to vector<8x1xf32>
    %cst_141 = arith.constant 7.812500e-03 : f32
    %301 = vector.broadcast %cst_141 : f32 to vector<8x1xf32>
    %302 = arith.mulf %300, %301 : vector<8x1xf32>
    %cst_142 = arith.constant 9.99999974E-6 : f32
    %303 = vector.broadcast %cst_142 : f32 to vector<8x1xf32>
    %304 = arith.addf %302, %303 : vector<8x1xf32>
    %305 = math.rsqrt %304 : vector<8x1xf32>
    %306 = vector.broadcast %305 : vector<8x1xf32> to vector<8x128xf32>
    %307 = arith.mulf %297, %306 : vector<8x128xf32>
    %c4_143 = arith.constant 4 : index
    %c0_144 = arith.constant 0 : index
    %c0_145 = arith.constant 0 : index
    %308 = vector.load %arg6[%c4_143, %c0_144, %c0_145] : memref<7x8x1xf32, #tpu.memory_space<vmem>>, vector<1x8x1xf32>
    %309 = vector.shape_cast %308 : vector<1x8x1xf32> to vector<8x1xf32>
    %310 = vector.broadcast %309 : vector<8x1xf32> to vector<8x128xf32>
    %311 = arith.mulf %307, %310 : vector<8x128xf32>
    %c4_146 = arith.constant 4 : index
    %c0_147 = arith.constant 0 : index
    %c0_148 = arith.constant 0 : index
    %312 = vector.load %arg7[%c4_146, %c0_147, %c0_148] : memref<7x8x1xf32, #tpu.memory_space<vmem>>, vector<1x8x1xf32>
    %313 = vector.shape_cast %312 : vector<1x8x1xf32> to vector<8x1xf32>
    %314 = vector.broadcast %313 : vector<8x1xf32> to vector<8x128xf32>
    %315 = arith.addf %311, %314 : vector<8x128xf32>
    %c4_149 = arith.constant 4 : index
    %c0_150 = arith.constant 0 : index
    %c0_151 = arith.constant 0 : index
    %316 = vector.load %arg4[%c4_149, %c0_150, %c0_151] : memref<7x16x8xf32, #tpu.memory_space<vmem>>, vector<1x16x8xf32>
    %317 = vector.shape_cast %316 : vector<1x16x8xf32> to vector<16x8xf32>
    %cst_152 = arith.constant dense<0.000000e+00> : vector<16x128xf32>
    %318 = tpu.matmul %317, %315, %cst_152 {dimension_numbers = #tpu.dot_dimension_numbers<[1], [0], [0], [1], [0, 0, 1, 1], [], []>} : vector<16x8xf32>, vector<8x128xf32>, vector<16x128xf32> -> vector<16x128xf32>
    %c4_153 = arith.constant 4 : index
    %c0_154 = arith.constant 0 : index
    %c0_155 = arith.constant 0 : index
    %319 = vector.load %arg5[%c4_153, %c0_154, %c0_155] : memref<7x16x1xf32, #tpu.memory_space<vmem>>, vector<1x16x1xf32>
    %320 = vector.shape_cast %319 : vector<1x16x1xf32> to vector<16x1xf32>
    %321 = vector.broadcast %320 : vector<16x1xf32> to vector<16x128xf32>
    %322 = arith.addf %318, %321 : vector<16x128xf32>
    %323 = vector.extract_strided_slice %322 {offsets = [0, 0], sizes = [8, 128], strides = [1, 1]} : vector<16x128xf32> to vector<8x128xf32>
    %324 = arith.addf %261, %323 : vector<8x128xf32>
    %325 = vector.extract_strided_slice %322 {offsets = [8, 0], sizes = [8, 128], strides = [1, 1]} : vector<16x128xf32> to vector<8x128xf32>
    %326 = arith.addf %263, %325 : vector<8x128xf32>
    %c16_i32 = arith.constant 16 : i32
    %327 = vector.broadcast %c16_i32 : i32 to vector<8x128xi32>
    %328 = arith.cmpi sge, %18, %327 : vector<8x128xi32>
    %329 = vector.extract_strided_slice %326 {offsets = [0, 112], sizes = [8, 16], strides = [1, 1]} : vector<8x128xf32> to vector<8x16xf32>
    %330 = vector.extract_strided_slice %326 {offsets = [0, 0], sizes = [8, 112], strides = [1, 1]} : vector<8x128xf32> to vector<8x112xf32>
    %331 = tpu.concatenate %329, %330 in 1 : vector<8x16xf32>, vector<8x112xf32> -> vector<8x128xf32>
    %cst_156 = arith.constant 0.000000e+00 : f32
    %332 = vector.broadcast %cst_156 : f32 to vector<8x128xf32>
    %333 = arith.select %328, %331, %332 : vector<8x128xi1>, vector<8x128xf32>
    %c48_i32 = arith.constant 48 : i32
    %334 = vector.broadcast %c48_i32 : i32 to vector<8x128xi32>
    %335 = arith.cmpi slt, %18, %334 : vector<8x128xi32>
    %336 = vector.extract_strided_slice %326 {offsets = [0, 16], sizes = [8, 112], strides = [1, 1]} : vector<8x128xf32> to vector<8x112xf32>
    %337 = vector.extract_strided_slice %326 {offsets = [0, 0], sizes = [8, 16], strides = [1, 1]} : vector<8x128xf32> to vector<8x16xf32>
    %338 = tpu.concatenate %336, %337 in 1 : vector<8x112xf32>, vector<8x16xf32> -> vector<8x128xf32>
    %cst_157 = arith.constant 0.000000e+00 : f32
    %339 = vector.broadcast %cst_157 : f32 to vector<8x128xf32>
    %340 = arith.select %335, %338, %339 : vector<8x128xi1>, vector<8x128xf32>
    %c5 = arith.constant 5 : index
    %c0_158 = arith.constant 0 : index
    %c0_159 = arith.constant 0 : index
    %341 = vector.load %arg1[%c5, %c0_158, %c0_159] : memref<7x16x8xf32, #tpu.memory_space<vmem>>, vector<1x16x8xf32>
    %342 = vector.shape_cast %341 : vector<1x16x8xf32> to vector<16x8xf32>
    %cst_160 = arith.constant dense<0.000000e+00> : vector<16x128xf32>
    %343 = tpu.matmul %342, %333, %cst_160 {dimension_numbers = #tpu.dot_dimension_numbers<[1], [0], [0], [1], [0, 0, 1, 1], [], []>} : vector<16x8xf32>, vector<8x128xf32>, vector<16x128xf32> -> vector<16x128xf32>
    %c5_161 = arith.constant 5 : index
    %c0_162 = arith.constant 0 : index
    %c0_163 = arith.constant 0 : index
    %344 = vector.load %arg2[%c5_161, %c0_162, %c0_163] : memref<7x16x8xf32, #tpu.memory_space<vmem>>, vector<1x16x8xf32>
    %345 = vector.shape_cast %344 : vector<1x16x8xf32> to vector<16x8xf32>
    %cst_164 = arith.constant dense<0.000000e+00> : vector<16x128xf32>
    %346 = tpu.matmul %345, %340, %cst_164 {dimension_numbers = #tpu.dot_dimension_numbers<[1], [0], [0], [1], [0, 0, 1, 1], [], []>} : vector<16x8xf32>, vector<8x128xf32>, vector<16x128xf32> -> vector<16x128xf32>
    %347 = arith.addf %343, %346 : vector<16x128xf32>
    %c5_165 = arith.constant 5 : index
    %c0_166 = arith.constant 0 : index
    %c0_167 = arith.constant 0 : index
    %348 = vector.load %arg3[%c5_165, %c0_166, %c0_167] : memref<7x16x1xf32, #tpu.memory_space<vmem>>, vector<1x16x1xf32>
    %349 = vector.shape_cast %348 : vector<1x16x1xf32> to vector<16x1xf32>
    %350 = vector.broadcast %349 : vector<16x1xf32> to vector<16x128xf32>
    %351 = arith.addf %347, %350 : vector<16x128xf32>
    %352 = vector.extract_strided_slice %351 {offsets = [0, 0], sizes = [8, 128], strides = [1, 1]} : vector<16x128xf32> to vector<8x128xf32>
    %353 = vector.extract_strided_slice %351 {offsets = [8, 0], sizes = [8, 128], strides = [1, 1]} : vector<16x128xf32> to vector<8x128xf32>
    %354 = arith.mulf %352, %353 : vector<8x128xf32>
    %cst_168 = arith.constant dense<0.000000e+00> : vector<8xf32>
    %355 = vector.multi_reduction <add>, %354, %cst_168 [1] : vector<8x128xf32> to vector<8xf32>
    %356 = vector.shape_cast %355 : vector<8xf32> to vector<8x1xf32>
    %cst_169 = arith.constant 7.812500e-03 : f32
    %357 = vector.broadcast %cst_169 : f32 to vector<8x1xf32>
    %358 = arith.mulf %356, %357 : vector<8x1xf32>
    %359 = vector.broadcast %358 : vector<8x1xf32> to vector<8x128xf32>
    %360 = arith.subf %354, %359 : vector<8x128xf32>
    %361 = arith.mulf %360, %360 : vector<8x128xf32>
    %cst_170 = arith.constant dense<0.000000e+00> : vector<8xf32>
    %362 = vector.multi_reduction <add>, %361, %cst_170 [1] : vector<8x128xf32> to vector<8xf32>
    %363 = vector.shape_cast %362 : vector<8xf32> to vector<8x1xf32>
    %cst_171 = arith.constant 7.812500e-03 : f32
    %364 = vector.broadcast %cst_171 : f32 to vector<8x1xf32>
    %365 = arith.mulf %363, %364 : vector<8x1xf32>
    %cst_172 = arith.constant 9.99999974E-6 : f32
    %366 = vector.broadcast %cst_172 : f32 to vector<8x1xf32>
    %367 = arith.addf %365, %366 : vector<8x1xf32>
    %368 = math.rsqrt %367 : vector<8x1xf32>
    %369 = vector.broadcast %368 : vector<8x1xf32> to vector<8x128xf32>
    %370 = arith.mulf %360, %369 : vector<8x128xf32>
    %c5_173 = arith.constant 5 : index
    %c0_174 = arith.constant 0 : index
    %c0_175 = arith.constant 0 : index
    %371 = vector.load %arg6[%c5_173, %c0_174, %c0_175] : memref<7x8x1xf32, #tpu.memory_space<vmem>>, vector<1x8x1xf32>
    %372 = vector.shape_cast %371 : vector<1x8x1xf32> to vector<8x1xf32>
    %373 = vector.broadcast %372 : vector<8x1xf32> to vector<8x128xf32>
    %374 = arith.mulf %370, %373 : vector<8x128xf32>
    %c5_176 = arith.constant 5 : index
    %c0_177 = arith.constant 0 : index
    %c0_178 = arith.constant 0 : index
    %375 = vector.load %arg7[%c5_176, %c0_177, %c0_178] : memref<7x8x1xf32, #tpu.memory_space<vmem>>, vector<1x8x1xf32>
    %376 = vector.shape_cast %375 : vector<1x8x1xf32> to vector<8x1xf32>
    %377 = vector.broadcast %376 : vector<8x1xf32> to vector<8x128xf32>
    %378 = arith.addf %374, %377 : vector<8x128xf32>
    %c5_179 = arith.constant 5 : index
    %c0_180 = arith.constant 0 : index
    %c0_181 = arith.constant 0 : index
    %379 = vector.load %arg4[%c5_179, %c0_180, %c0_181] : memref<7x16x8xf32, #tpu.memory_space<vmem>>, vector<1x16x8xf32>
    %380 = vector.shape_cast %379 : vector<1x16x8xf32> to vector<16x8xf32>
    %cst_182 = arith.constant dense<0.000000e+00> : vector<16x128xf32>
    %381 = tpu.matmul %380, %378, %cst_182 {dimension_numbers = #tpu.dot_dimension_numbers<[1], [0], [0], [1], [0, 0, 1, 1], [], []>} : vector<16x8xf32>, vector<8x128xf32>, vector<16x128xf32> -> vector<16x128xf32>
    %c5_183 = arith.constant 5 : index
    %c0_184 = arith.constant 0 : index
    %c0_185 = arith.constant 0 : index
    %382 = vector.load %arg5[%c5_183, %c0_184, %c0_185] : memref<7x16x1xf32, #tpu.memory_space<vmem>>, vector<1x16x1xf32>
    %383 = vector.shape_cast %382 : vector<1x16x1xf32> to vector<16x1xf32>
    %384 = vector.broadcast %383 : vector<16x1xf32> to vector<16x128xf32>
    %385 = arith.addf %381, %384 : vector<16x128xf32>
    %386 = vector.extract_strided_slice %385 {offsets = [0, 0], sizes = [8, 128], strides = [1, 1]} : vector<16x128xf32> to vector<8x128xf32>
    %387 = arith.addf %324, %386 : vector<8x128xf32>
    %388 = vector.extract_strided_slice %385 {offsets = [8, 0], sizes = [8, 128], strides = [1, 1]} : vector<16x128xf32> to vector<8x128xf32>
    %389 = arith.addf %326, %388 : vector<8x128xf32>
    %c32_i32 = arith.constant 32 : i32
    %390 = vector.broadcast %c32_i32 : i32 to vector<8x128xi32>
    %391 = arith.cmpi sge, %18, %390 : vector<8x128xi32>
    %392 = vector.extract_strided_slice %389 {offsets = [0, 96], sizes = [8, 32], strides = [1, 1]} : vector<8x128xf32> to vector<8x32xf32>
    %393 = vector.extract_strided_slice %389 {offsets = [0, 0], sizes = [8, 96], strides = [1, 1]} : vector<8x128xf32> to vector<8x96xf32>
    %394 = tpu.concatenate %392, %393 in 1 : vector<8x32xf32>, vector<8x96xf32> -> vector<8x128xf32>
    %cst_186 = arith.constant 0.000000e+00 : f32
    %395 = vector.broadcast %cst_186 : f32 to vector<8x128xf32>
    %396 = arith.select %391, %394, %395 : vector<8x128xi1>, vector<8x128xf32>
    %c32_i32_187 = arith.constant 32 : i32
    %397 = vector.broadcast %c32_i32_187 : i32 to vector<8x128xi32>
    %398 = arith.cmpi slt, %18, %397 : vector<8x128xi32>
    %399 = vector.extract_strided_slice %389 {offsets = [0, 32], sizes = [8, 96], strides = [1, 1]} : vector<8x128xf32> to vector<8x96xf32>
    %400 = vector.extract_strided_slice %389 {offsets = [0, 0], sizes = [8, 32], strides = [1, 1]} : vector<8x128xf32> to vector<8x32xf32>
    %401 = tpu.concatenate %399, %400 in 1 : vector<8x96xf32>, vector<8x32xf32> -> vector<8x128xf32>
    %cst_188 = arith.constant 0.000000e+00 : f32
    %402 = vector.broadcast %cst_188 : f32 to vector<8x128xf32>
    %403 = arith.select %398, %401, %402 : vector<8x128xi1>, vector<8x128xf32>
    %c6 = arith.constant 6 : index
    %c0_189 = arith.constant 0 : index
    %c0_190 = arith.constant 0 : index
    %404 = vector.load %arg1[%c6, %c0_189, %c0_190] : memref<7x16x8xf32, #tpu.memory_space<vmem>>, vector<1x16x8xf32>
    %405 = vector.shape_cast %404 : vector<1x16x8xf32> to vector<16x8xf32>
    %cst_191 = arith.constant dense<0.000000e+00> : vector<16x128xf32>
    %406 = tpu.matmul %405, %396, %cst_191 {dimension_numbers = #tpu.dot_dimension_numbers<[1], [0], [0], [1], [0, 0, 1, 1], [], []>} : vector<16x8xf32>, vector<8x128xf32>, vector<16x128xf32> -> vector<16x128xf32>
    %c6_192 = arith.constant 6 : index
    %c0_193 = arith.constant 0 : index
    %c0_194 = arith.constant 0 : index
    %407 = vector.load %arg2[%c6_192, %c0_193, %c0_194] : memref<7x16x8xf32, #tpu.memory_space<vmem>>, vector<1x16x8xf32>
    %408 = vector.shape_cast %407 : vector<1x16x8xf32> to vector<16x8xf32>
    %cst_195 = arith.constant dense<0.000000e+00> : vector<16x128xf32>
    %409 = tpu.matmul %408, %403, %cst_195 {dimension_numbers = #tpu.dot_dimension_numbers<[1], [0], [0], [1], [0, 0, 1, 1], [], []>} : vector<16x8xf32>, vector<8x128xf32>, vector<16x128xf32> -> vector<16x128xf32>
    %410 = arith.addf %406, %409 : vector<16x128xf32>
    %c6_196 = arith.constant 6 : index
    %c0_197 = arith.constant 0 : index
    %c0_198 = arith.constant 0 : index
    %411 = vector.load %arg3[%c6_196, %c0_197, %c0_198] : memref<7x16x1xf32, #tpu.memory_space<vmem>>, vector<1x16x1xf32>
    %412 = vector.shape_cast %411 : vector<1x16x1xf32> to vector<16x1xf32>
    %413 = vector.broadcast %412 : vector<16x1xf32> to vector<16x128xf32>
    %414 = arith.addf %410, %413 : vector<16x128xf32>
    %415 = vector.extract_strided_slice %414 {offsets = [0, 0], sizes = [8, 128], strides = [1, 1]} : vector<16x128xf32> to vector<8x128xf32>
    %416 = vector.extract_strided_slice %414 {offsets = [8, 0], sizes = [8, 128], strides = [1, 1]} : vector<16x128xf32> to vector<8x128xf32>
    %417 = arith.mulf %415, %416 : vector<8x128xf32>
    %cst_199 = arith.constant dense<0.000000e+00> : vector<8xf32>
    %418 = vector.multi_reduction <add>, %417, %cst_199 [1] : vector<8x128xf32> to vector<8xf32>
    %419 = vector.shape_cast %418 : vector<8xf32> to vector<8x1xf32>
    %cst_200 = arith.constant 7.812500e-03 : f32
    %420 = vector.broadcast %cst_200 : f32 to vector<8x1xf32>
    %421 = arith.mulf %419, %420 : vector<8x1xf32>
    %422 = vector.broadcast %421 : vector<8x1xf32> to vector<8x128xf32>
    %423 = arith.subf %417, %422 : vector<8x128xf32>
    %424 = arith.mulf %423, %423 : vector<8x128xf32>
    %cst_201 = arith.constant dense<0.000000e+00> : vector<8xf32>
    %425 = vector.multi_reduction <add>, %424, %cst_201 [1] : vector<8x128xf32> to vector<8xf32>
    %426 = vector.shape_cast %425 : vector<8xf32> to vector<8x1xf32>
    %cst_202 = arith.constant 7.812500e-03 : f32
    %427 = vector.broadcast %cst_202 : f32 to vector<8x1xf32>
    %428 = arith.mulf %426, %427 : vector<8x1xf32>
    %cst_203 = arith.constant 9.99999974E-6 : f32
    %429 = vector.broadcast %cst_203 : f32 to vector<8x1xf32>
    %430 = arith.addf %428, %429 : vector<8x1xf32>
    %431 = math.rsqrt %430 : vector<8x1xf32>
    %432 = vector.broadcast %431 : vector<8x1xf32> to vector<8x128xf32>
    %433 = arith.mulf %423, %432 : vector<8x128xf32>
    %c6_204 = arith.constant 6 : index
    %c0_205 = arith.constant 0 : index
    %c0_206 = arith.constant 0 : index
    %434 = vector.load %arg6[%c6_204, %c0_205, %c0_206] : memref<7x8x1xf32, #tpu.memory_space<vmem>>, vector<1x8x1xf32>
    %435 = vector.shape_cast %434 : vector<1x8x1xf32> to vector<8x1xf32>
    %436 = vector.broadcast %435 : vector<8x1xf32> to vector<8x128xf32>
    %437 = arith.mulf %433, %436 : vector<8x128xf32>
    %c6_207 = arith.constant 6 : index
    %c0_208 = arith.constant 0 : index
    %c0_209 = arith.constant 0 : index
    %438 = vector.load %arg7[%c6_207, %c0_208, %c0_209] : memref<7x8x1xf32, #tpu.memory_space<vmem>>, vector<1x8x1xf32>
    %439 = vector.shape_cast %438 : vector<1x8x1xf32> to vector<8x1xf32>
    %440 = vector.broadcast %439 : vector<8x1xf32> to vector<8x128xf32>
    %441 = arith.addf %437, %440 : vector<8x128xf32>
    %c6_210 = arith.constant 6 : index
    %c0_211 = arith.constant 0 : index
    %c0_212 = arith.constant 0 : index
    %442 = vector.load %arg4[%c6_210, %c0_211, %c0_212] : memref<7x16x8xf32, #tpu.memory_space<vmem>>, vector<1x16x8xf32>
    %443 = vector.shape_cast %442 : vector<1x16x8xf32> to vector<16x8xf32>
    %cst_213 = arith.constant dense<0.000000e+00> : vector<16x128xf32>
    %444 = tpu.matmul %443, %441, %cst_213 {dimension_numbers = #tpu.dot_dimension_numbers<[1], [0], [0], [1], [0, 0, 1, 1], [], []>} : vector<16x8xf32>, vector<8x128xf32>, vector<16x128xf32> -> vector<16x128xf32>
    %c6_214 = arith.constant 6 : index
    %c0_215 = arith.constant 0 : index
    %c0_216 = arith.constant 0 : index
    %445 = vector.load %arg5[%c6_214, %c0_215, %c0_216] : memref<7x16x1xf32, #tpu.memory_space<vmem>>, vector<1x16x1xf32>
    %446 = vector.shape_cast %445 : vector<1x16x1xf32> to vector<16x1xf32>
    %447 = vector.broadcast %446 : vector<16x1xf32> to vector<16x128xf32>
    %448 = arith.addf %444, %447 : vector<16x128xf32>
    %449 = vector.extract_strided_slice %448 {offsets = [0, 0], sizes = [8, 128], strides = [1, 1]} : vector<16x128xf32> to vector<8x128xf32>
    %450 = arith.addf %387, %449 : vector<8x128xf32>
    %451 = vector.extract_strided_slice %448 {offsets = [8, 0], sizes = [8, 128], strides = [1, 1]} : vector<16x128xf32> to vector<8x128xf32>
    %452 = arith.addf %389, %451 : vector<8x128xf32>
    %c0_217 = arith.constant 0 : index
    %c0_218 = arith.constant 0 : index
    %453 = vector.load %arg8[%c0_217, %c0_218] : memref<16x1xf32, #tpu.memory_space<vmem>>, vector<8x1xf32>
    %454 = vector.broadcast %453 : vector<8x1xf32> to vector<8x128xf32>
    %455 = arith.addf %450, %454 : vector<8x128xf32>
    %c0_219 = arith.constant 0 : index
    %c0_220 = arith.constant 0 : index
    %456 = vector.load %arg10[%c0_219, %c0_220] : memref<8x128xf32, #tpu.memory_space<vmem>>, vector<8x128xf32>
    tpu.vector_store %arg10[%c0_219, %c0_220], %455 {strides = array<i32>} : memref<8x128xf32, #tpu.memory_space<vmem>>, vector<8x128xf32>,
    %c8 = arith.constant 8 : index
    %c0_221 = arith.constant 0 : index
    %457 = vector.load %arg8[%c8, %c0_221] : memref<16x1xf32, #tpu.memory_space<vmem>>, vector<8x1xf32>
    %458 = vector.broadcast %457 : vector<8x1xf32> to vector<8x128xf32>
    %459 = arith.addf %452, %458 : vector<8x128xf32>
    %c0_222 = arith.constant 0 : index
    %c0_223 = arith.constant 0 : index
    %460 = vector.load %arg9[%c0_222, %c0_223] : memref<8x128xf32, #tpu.memory_space<vmem>>, vector<8x128xf32>
    tpu.vector_store %arg9[%c0_222, %c0_223], %459 {strides = array<i32>} : memref<8x128xf32, #tpu.memory_space<vmem>>, vector<8x128xf32>,
    return
  }
}

</mosaic_0001>

<bundles_post_ra>
// kernel: bitwise_wavenet_block.1
= control target key start
LH: loop header
LB: loop body
LE: loop exit
PB: predicated region body
PF: predicated region fallthrough
CT: control target
= control target key end

     0   :  { %vm59_vm0 = vcmask 64512   ;;  %v2646_v3 = vmov 0   ;;  %s2647_s19 = smov 1   ;;  %v35_v7 = vlaneseq  ;;  %s2648_s20 = smov 127   ;;  %s3096_s0 = inlined_call_operand.vmem [shape: f32[8,128], index: 0, kind: input, shape index: {}, may-alias: {0,9}]   ;;  %s3097_s2 = inlined_call_operand.vmem [shape: f32[7,16,8], index: 2, kind: input, shape index: {}]   ;;  %s3098_s1 = inlined_call_operand.vmem [shape: f32[7,16,8], index: 1, kind: input, shape index: {}]   ;;  %s3099_s3 = inlined_call_operand.vmem [shape: f32[7,16,1], index: 3, kind: input, shape index: {}]   ;;  %s3100_s6 = inlined_call_operand.vmem [shape: f32[7,8,1], index: 6, kind: input, shape index: {}]   ;;  %s3101_s5 = inlined_call_operand.vmem [shape: f32[7,16,1], index: 5, kind: input, shape index: {}]   ;;  %s3102_s7 = inlined_call_operand.vmem [shape: f32[7,8,1], index: 7, kind: input, shape index: {}]   ;;  %s3103_s4 = inlined_call_operand.vmem [shape: f32[7,16,8], index: 4, kind: input, shape index: {}]   ;;  %s3104_s8 = inlined_call_operand.vmem [shape: f32[16,1], index: 8, kind: input, shape index: {}]   ;;  %s3105_s9 = inlined_call_operand.vmem [shape: f32[8,128], index: 9, kind: output, shape index: {0}, may-alias: {0,9}]   ;;  %s3106_s10 = inlined_call_operand.vmem [shape: f32[8,128], index: 10, kind: output, shape index: {1}]  }
   0x1   :  { %v2717_v0 = vld [vmem:[%s3096_s0] sm:$0xff]  ;;  %v58_v2 = vld [vmem:[%s3097_s2 + $0x8] sm:$0xff]  ;;  %2631 = vset.pattern.permute.xlu1 %v2646_v3  ;;  %2630 = vset.pattern.permute.xlu0 %v2646_v3  ;;  %v2317_v37 = vld [vmem:[%s3097_s2 + $0x10] sm:$0xff]  ;;  %s2649_s21 = smov 2   ;;  %s2650_s22 = smov 126  }
   0x2   :  { %v57_v1 = vld [vmem:[%s3097_s2] sm:$0xff]  ;;  %51 = vrot.lane.b32.xlu0 %v2717_v0, %s2647_s19  ;;  %2498 = vmatprep.subr.mxu0 %v2717_v0  ;;  %v223_v5 = vld [vmem:[%s3099_s3 + $0x8] sm:$0xff]  ;;  %v36_v8 = vand.u32 127, %v35_v7  ;;  %v2326_v43 = vld [vmem:[%s3099_s3 + $0x18] sm:$0xff]  ;;  %s2651_s24 = smov 4   ;;  %s2652_s25 = smov 124  }
   0x3   :  { %v55_v4 = vld [vmem:[%s3098_s1] sm:$0xff]  ;;  %2499 = vmatpush3.msra.mxu0 %v2717_v0  ;;  %2500 = vmatprep.mubr.msk.f32.mxu0 %vm59_vm0, %v57_v1  ;;  %v56_v11 = vld [vmem:[%s3098_s1 + $0x8] sm:$0xff]  ;;  %v2325_v44 = vld [vmem:[%s3099_s3 + $0x10] sm:$0xff]  ;;  %s2653_s26 = smov 8   ;;  %s2654_s27 = smov 120  }
   0x4   :  { %v222_v6 = vld [vmem:[%s3099_s3] sm:$0xff]  ;;  %2501 = vmatmul.mubr.msk.f32.vlgmr.msra.gmra.mrb[0].mxu0 %vm59_vm0, %v58_v2  ;;  %231 = vperm.xlu1 %2631, %v223_v5   ;;  %v2741_v9 = vand.u32 63, %v36_v8  ;;  %v265_v20 = vld [vmem:[%s3101_s5 + $0x8] sm:$0xff]  ;;  %v2318_v46 = vld [vmem:[%s3097_s2 + $0x18] sm:$0xff]  ;;  %s2655_s29 = smov 16   ;;  %s2656_s30 = smov 112  }
   0x5   :  { %2505 = vmatprep.mubr.msk.f32.mxu0 %vm59_vm0, %v55_v4  ;;  %v248_v19 = vld [vmem:[%s3100_s6] sm:$0xff]  ;;  %v263_v36 = vld [vmem:[%s3103_s4 + $0x8] sm:$0xff]  ;;  %v2315_v47 = vld [vmem:[%s3098_s1 + $0x10] sm:$0xff]  ;;  %s2657_s12 = smov 32   ;;  %s2658_s13 = smov 96  }
   0x6   :  { %226 = vperm.xlu0 %2630, %v222_v6   ;;  %vm49_vm1 = vcmp.ge.s32.totalorder %v2741_v9, 1  ;;  %v255_v25 = vld [vmem:[%s3102_s7] sm:$0xff]  ;;  %vm364_vm2 = vcmp.lt.s32.totalorder %v2741_v9, 63  ;;  %v2316_v49 = vld [vmem:[%s3098_s1 + $0x18] sm:$0xff]  ;;  %v2328_v57 = vld [vmem:[%s3102_s7 + $0x8] sm:$0xff]  ;;  %vm685_vm3 = vcmp.lt.s32.totalorder %v2741_v9, 62 }
   0x7   :  { %v262_v26 = vld [vmem:[%s3103_s4] sm:$0xff]  ;;  %v2332_v58 = vld [vmem:[%s3101_s5 + $0x18] sm:$0xff]  ;;  %v2327_v63 = vld [vmem:[%s3100_s6 + $0x8] sm:$0xff]  ;;  %vm679_vm4 = vcmp.ge.s32.totalorder %v2741_v9, 2  ;;  %vm1006_vm5 = vcmp.lt.s32.totalorder %v2741_v9, 60  ;;  %vm1000_vm6 = vcmp.ge.s32.totalorder %v2741_v9, 4 }
   0x8   :  { %2510 = vmatprep.mubr.msk.f32.mxu1 %vm59_vm0, %v262_v26  ;;  %vm1327_vm7 = vcmp.lt.s32.totalorder %v2741_v9, 56  ;;  %vm1321_vm8 = vcmp.ge.s32.totalorder %v2741_v9, 8  ;;  %vm1648_vm9 = vcmp.lt.s32.totalorder %v2741_v9, 48  ;;  %vm1642_vm10 = vcmp.ge.s32.totalorder %v2741_v9, 16 }
   0x9   :  { %vm1969_vm11 = vcmp.lt.s32.totalorder %v2741_v9, 32  ;;  %vm1963_vm12 = vcmp.ge.s32.totalorder %v2741_v9, 32 }
  0x74   :  { %v52_v10 = vpop.permute.xlu0 %51 }
  0x75   :  { %2503 = vmatprep.subr.msk.mxu0 %vm49_vm1, %v52_v10 }
  0x76   :  { %2504 = vmatpush3.msk.msra.mxu0 %vm49_vm1, %v52_v10 }
  0x77   :  { %2506 = vmatmul.mubr.msk.f32.vlgmr.msra.gmra.mrb[0].mxu0 %vm59_vm0, %v56_v11  ;;  %v2330_v11 = vld [vmem:[%s3103_s4 + $0x18] sm:$0xff] }
  0x83   :  { %v232_v12 = vpop.permute.xlu1 %231 }
  0x85   :  { %v227_v13 = vpop.permute.xlu0 %226 }
 0x14a   :  { %v2507_v14 = vpop.f32.mrb[0].mxu0 }
 0x14b   :  { %v235_v15 = vadd.f32 %v2507_v14, %v232_v12  ;;  %v213_v16 = vpop.f32.mrb[1].mxu0  ;;  %v2337_v12 = vld [vmem:[%s3097_s2 + $0x20] sm:$0xff] }
 0x14c   :  { %v234_v17 = vadd.f32 %v227_v13, %v213_v16 }
 0x14e   :  { %v236_v18 = vmul.f32 %v235_v15, %v234_v17 }
 0x150   :  { %237 = vadd.xlane.f32.xlu1 %v236_v18 }
 0x161   :  { %251 = vperm.xlu1 %2631, %v248_v19   ;;  %v2345_v19 = vld [vmem:[%s3099_s3 + $0x20] sm:$0xff] }
 0x165   :  { %273 = vperm.xlu1 %2631, %v265_v20  }
 0x1dd   :  { %v238_v21 = vpop.xlane.xlu1 %237 }
 0x1de   :  { %v239_v22 = vmul.f32 0.0078125, %v238_v21  ;;  %v2338_v21 = vld [vmem:[%s3097_s2 + $0x28] sm:$0xff] }
 0x1e0   :  { %v240_v23 = vsub.f32 %v236_v18, %v239_v22  ;;  %v2346_v18 = vld [vmem:[%s3099_s3 + $0x28] sm:$0xff]  ;;  %v2335_v22 = vld [vmem:[%s3098_s1 + $0x20] sm:$0xff] }
 0x1e1   :  { %v252_v32 = vpop.permute.xlu1 %251 }
 0x1e2   :  { %v241_v24 = vmul.f32 %v240_v23, %v240_v23 }
 0x1e4   :  { %242 = vadd.xlane.f32.xlu0 %v241_v24  ;;  %v2336_v24 = vld [vmem:[%s3098_s1 + $0x28] sm:$0xff] }
 0x1e5   :  { %v274_v38 = vpop.permute.xlu1 %273 }
 0x1fa   :  { %258 = vperm.xlu0 %2630, %v255_v25  }
 0x271   :  { %v243_v27 = vpop.xlane.xlu0 %242 }
 0x272   :  { %v244_v28 = vmul.f32 0.0078125, %v243_v27 }
 0x274   :  { %v245_v29 = vadd.f32 1e-05, %v244_v28 }
 0x276   :  { %2632 = vrsqrt.f32 %v245_v29 }
 0x279   :  { %v259_v34 = vpop.permute.xlu0 %258 }
 0x280   :  { %v2633_v30 = vpop.eup %2632 }
 0x281   :  { %v247_v31 = vmul.f32 %v2633_v30, %v240_v23 }
 0x283   :  { %v254_v33 = vmul.f32 %v252_v32, %v247_v31  ;;  %v2347_v32 = vld [vmem:[%s3100_s6 + $0x10] sm:$0xff] }
 0x285   :  { %v261_v35 = vadd.f32 %v259_v34, %v254_v33  ;;  %v2352_v33 = vld [vmem:[%s3101_s5 + $0x28] sm:$0xff] }
 0x287   :  { %2508 = vmatprep.subr.mxu1 %v261_v35 }
 0x288   :  { %2509 = vmatpush3.msra.mxu1 %v261_v35 }
 0x289   :  { %2511 = vmatmul.mubr.msk.f32.vlgmr.msra.gmra.mrb[0].mxu1 %vm59_vm0, %v263_v36 }
 0x28a   :  { %2515 = vmatprep.mubr.msk.f32.mxu1 %vm59_vm0, %v2317_v37 }
 0x35c   :  { %v2512_v39 = vpop.f32.mrb[0].mxu1 }
 0x35d   :  { %v354_v40 = vadd.f32 %v2512_v39, %v274_v38  ;;  %v2773_v41 = vpop.f32.mrb[1].mxu1  ;;  %v2348_v38 = vld [vmem:[%s3102_s7 + $0x10] sm:$0xff]  ;;  %v2349_v39 = vld [vmem:[%s3103_s4 + $0x20] sm:$0xff] }
 0x35f   :  { %v358_v42 = vadd.f32 %v354_v40, %v2717_v0  ;;  %v2329_v0 = vld [vmem:[%s3103_s4 + $0x10] sm:$0xff] }
 0x360   :  { %2525 = vmatprep.mubr.msk.f32.mxu0 %vm59_vm0, %v2329_v0 }
 0x361   :  { %360 = vrot.lane.b32.xlu0 %v358_v42, %s2647_s19  ;;  %365 = vrot.lane.b32.xlu1 %v358_v42, %s2648_s20 }
 0x365   :  { %547 = vperm.xlu0 %2630, %v2326_v43   ;;  %542 = vperm.xlu1 %2631, %v2325_v44  }
 0x3d3   :  { %v366_v45 = vpop.permute.xlu1 %365  ;;  %v361_v48 = vpop.permute.xlu0 %360 }
 0x3d4   :  { %2513 = vmatprep.subr.msk.mxu1 %vm364_vm2, %v366_v45 }
 0x3d5   :  { %2514 = vmatpush3.msk.msra.mxu1 %vm364_vm2, %v366_v45 }
 0x3d6   :  { %2516 = vmatmul.mubr.msk.f32.vlgmr.msra.gmra.mrb[2].mxu1 %vm59_vm0, %v2318_v46  ;;  %2518 = vmatprep.subr.msk.mxu1 %vm49_vm1, %v361_v48 }
 0x3d7   :  { %2519 = vmatpush3.msk.msra.mxu1 %vm49_vm1, %v361_v48  ;;  %2520 = vmatprep.mubr.msk.f32.mxu1 %vm59_vm0, %v2315_v47 }
 0x3de   :  { %2521 = vmatmul.mubr.msk.f32.vlgmr.msra.gmra.mrb[2].mxu1 %vm59_vm0, %v2316_v49 }
 0x3df   :  { %2540 = vmatprep.mubr.msk.f32.mxu1 %vm59_vm0, %v2349_v39  ;;  %v2376_v39 = vld [vmem:[%s3098_s1 + $0x48] sm:$0xff] }
 0x3e4   :  { %v548_v50 = vpop.permute.xlu0 %547  ;;  %v543_v52 = vpop.permute.xlu1 %542 }
 0x4b1   :  { %v2522_v51 = vpop.f32.mrb[2].mxu1 }
 0x4b2   :  { %v551_v53 = vadd.f32 %v2522_v51, %v548_v50  ;;  %v528_v54 = vpop.f32.mrb[3].mxu1  ;;  %v2350_v50 = vld [vmem:[%s3103_s4 + $0x28] sm:$0xff]  ;;  %v2357_v51 = vld [vmem:[%s3097_s2 + $0x30] sm:$0xff] }
 0x4b3   :  { %v550_v55 = vadd.f32 %v543_v52, %v528_v54 }
 0x4b5   :  { %v552_v56 = vmul.f32 %v551_v53, %v550_v55 }
 0x4b7   :  { %553 = vadd.xlane.f32.xlu1 %v552_v56 }
 0x4c8   :  { %576 = vperm.xlu1 %2631, %v2328_v57   ;;  %v2366_v57 = vld [vmem:[%s3099_s3 + $0x38] sm:$0xff] }
 0x4cc   :  { %593 = vperm.xlu1 %2631, %v2332_v58   ;;  %v2365_v58 = vld [vmem:[%s3099_s3 + $0x30] sm:$0xff] }
 0x544   :  { %v554_v59 = vpop.xlane.xlu1 %553 }
 0x545   :  { %v555_v60 = vmul.f32 0.0078125, %v554_v59 }
 0x547   :  { %v556_v61 = vsub.f32 %v552_v56, %v555_v60  ;;  %v2358_v60 = vld [vmem:[%s3097_s2 + $0x38] sm:$0xff] }
 0x548   :  { %v577_v8 = vpop.permute.xlu1 %576 }
 0x549   :  { %v557_v62 = vmul.f32 %v556_v61, %v556_v61 }
 0x54b   :  { %558 = vadd.xlane.f32.xlu0 %v557_v62 }
 0x54c   :  { %v594_v13 = vpop.permute.xlu1 %593 }
 0x561   :  { %568 = vperm.xlu0 %2630, %v2327_v63   ;;  %v2356_v63 = vld [vmem:[%s3098_s1 + $0x38] sm:$0xff] }
 0x5d8   :  { %v559_v1 = vpop.xlane.xlu0 %558 }
 0x5d9   :  { %v560_v2 = vmul.f32 0.0078125, %v559_v1 }
 0x5db   :  { %v561_v3 = vadd.f32 1e-05, %v560_v2 }
 0x5dd   :  { %2634 = vrsqrt.f32 %v561_v3 }
 0x5e0   :  { %v569_v6 = vpop.permute.xlu0 %568 }
 0x5e7   :  { %v2635_v4 = vpop.eup %2634 }
 0x5e8   :  { %v563_v5 = vmul.f32 %v2635_v4, %v556_v61  ;;  %v2355_v61 = vld [vmem:[%s3098_s1 + $0x30] sm:$0xff] }
 0x5ea   :  { %v571_v7 = vmul.f32 %v569_v6, %v563_v5 }
 0x5ec   :  { %v579_v10 = vadd.f32 %v577_v8, %v571_v7  ;;  %v2368_v7 = vld [vmem:[%s3102_s7 + $0x18] sm:$0xff] }
 0x5ed   :  { %v2372_v8 = vld [vmem:[%s3101_s5 + $0x38] sm:$0xff] }
 0x5ee   :  { %2523 = vmatprep.subr.mxu0 %v579_v10 }
 0x5ef   :  { %2524 = vmatpush3.msra.mxu0 %v579_v10 }
 0x5f0   :  { %2526 = vmatmul.mubr.msk.f32.vlgmr.msra.gmra.mrb[2].mxu0 %vm59_vm0, %v2330_v11 }
 0x5f1   :  { %2530 = vmatprep.mubr.msk.f32.mxu0 %vm59_vm0, %v2337_v12 }
 0x6c3   :  { %v2527_v14 = vpop.f32.mrb[2].mxu0 }
 0x6c4   :  { %v674_v15 = vadd.f32 %v2527_v14, %v594_v13  ;;  %v2821_v16 = vpop.f32.mrb[3].mxu0  ;;  %v2367_v14 = vld [vmem:[%s3100_s6 + $0x18] sm:$0xff] }
 0x6c6   :  { %v2823_v17 = vadd.f32 %v674_v15, %v358_v42  ;;  %v2369_v15 = vld [vmem:[%s3103_s4 + $0x30] sm:$0xff] }
 0x6c8   :  { %681 = vrot.lane.b32.xlu1 %v2823_v17, %s2649_s21  ;;  %686 = vrot.lane.b32.xlu0 %v2823_v17, %s2650_s22 }
 0x6cc   :  { %868 = vperm.xlu1 %2631, %v2346_v18   ;;  %863 = vperm.xlu0 %2630, %v2345_v19  }
 0x73a   :  { %v687_v20 = vpop.permute.xlu0 %686  ;;  %v682_v23 = vpop.permute.xlu1 %681 }
 0x73b   :  { %2528 = vmatprep.subr.msk.mxu0 %vm685_vm3, %v687_v20 }
 0x73c   :  { %2529 = vmatpush3.msk.msra.mxu0 %vm685_vm3, %v687_v20 }
 0x73d   :  { %2531 = vmatmul.mubr.msk.f32.vlgmr.msra.gmra.mrb[4].mxu0 %vm59_vm0, %v2338_v21  ;;  %2533 = vmatprep.subr.msk.mxu0 %vm679_vm4, %v682_v23 }
 0x73e   :  { %2534 = vmatpush3.msk.msra.mxu0 %vm679_vm4, %v682_v23  ;;  %2535 = vmatprep.mubr.msk.f32.mxu0 %vm59_vm0, %v2335_v22 }
 0x745   :  { %2536 = vmatmul.mubr.msk.f32.vlgmr.msra.gmra.mrb[4].mxu0 %vm59_vm0, %v2336_v24 }
 0x746   :  { %2555 = vmatprep.mubr.msk.f32.mxu0 %vm59_vm0, %v2369_v15 }
 0x74b   :  { %v869_v25 = vpop.permute.xlu1 %868  ;;  %v864_v27 = vpop.permute.xlu0 %863 }
 0x818   :  { %v2537_v26 = vpop.f32.mrb[4].mxu0 }
 0x819   :  { %v872_v28 = vadd.f32 %v2537_v26, %v869_v25  ;;  %v849_v29 = vpop.f32.mrb[5].mxu0  ;;  %v2370_v26 = vld [vmem:[%s3103_s4 + $0x38] sm:$0xff] }
 0x81a   :  { %v871_v30 = vadd.f32 %v864_v27, %v849_v29  ;;  %v2377_v27 = vld [vmem:[%s3097_s2 + $0x40] sm:$0xff] }
 0x81c   :  { %v873_v31 = vmul.f32 %v872_v28, %v871_v30 }
 0x81e   :  { %874 = vadd.xlane.f32.xlu0 %v873_v31 }
 0x834   :  { %889 = vperm.xlu0 %2630, %v2347_v32  }
 0x838   :  { %914 = vperm.xlu0 %2630, %v2352_v33   ;;  %v2386_v33 = vld [vmem:[%s3099_s3 + $0x48] sm:$0xff] }
 0x8ab   :  { %v875_v34 = vpop.xlane.xlu0 %874 }
 0x8ac   :  { %v876_v35 = vmul.f32 0.0078125, %v875_v34  ;;  %v2385_v34 = vld [vmem:[%s3099_s3 + $0x40] sm:$0xff] }
 0x8ae   :  { %v877_v36 = vsub.f32 %v873_v31, %v876_v35 }
 0x8b0   :  { %v878_v37 = vmul.f32 %v877_v36, %v877_v36 }
 0x8b2   :  { %879 = vadd.xlane.f32.xlu1 %v878_v37  ;;  %v2375_v37 = vld [vmem:[%s3098_s1 + $0x40] sm:$0xff] }
 0x8b3   :  { %v890_v46 = vpop.permute.xlu0 %889 }
 0x8b7   :  { %v915_v52 = vpop.permute.xlu0 %914 }
 0x8c3   :  { %897 = vperm.xlu1 %2631, %v2348_v38  }
 0x93f   :  { %v880_v40 = vpop.xlane.xlu1 %879 }
 0x940   :  { %v881_v42 = vmul.f32 0.0078125, %v880_v40 }
 0x942   :  { %v882_v43 = vadd.f32 1e-05, %v881_v42 }
 0x943   :  { %v898_v48 = vpop.permute.xlu1 %897 }
 0x944   :  { %2636 = vrsqrt.f32 %v882_v43 }
 0x94e   :  { %v2637_v44 = vpop.eup %2636 }
 0x94f   :  { %v884_v45 = vmul.f32 %v2637_v44, %v877_v36  ;;  %v2378_v36 = vld [vmem:[%s3097_s2 + $0x48] sm:$0xff] }
 0x951   :  { %v892_v47 = vmul.f32 %v890_v46, %v884_v45 }
 0x953   :  { %v900_v49 = vadd.f32 %v898_v48, %v892_v47  ;;  %v2387_v48 = vld [vmem:[%s3100_s6 + $0x20] sm:$0xff] }
 0x955   :  { %2538 = vmatprep.subr.mxu1 %v900_v49 }
 0x956   :  { %2539 = vmatpush3.msra.mxu1 %v900_v49  ;;  %v2392_v49 = vld [vmem:[%s3101_s5 + $0x48] sm:$0xff] }
 0x957   :  { %2541 = vmatmul.mubr.msk.f32.vlgmr.msra.gmra.mrb[4].mxu1 %vm59_vm0, %v2350_v50 }
 0x958   :  { %2545 = vmatprep.mubr.msk.f32.mxu1 %vm59_vm0, %v2357_v51 }
 0xa2a   :  { %v2542_v53 = vpop.f32.mrb[4].mxu1 }
 0xa2b   :  { %v995_v54 = vadd.f32 %v2542_v53, %v915_v52  ;;  %v2868_v55 = vpop.f32.mrb[5].mxu1 }
 0xa2d   :  { %v2871_v56 = vadd.f32 %v995_v54, %v2823_v17  ;;  %v2388_v54 = vld [vmem:[%s3102_s7 + $0x20] sm:$0xff] }
 0xa2f   :  { %1002 = vrot.lane.b32.xlu0 %v2871_v56, %s2651_s24  ;;  %1007 = vrot.lane.b32.xlu1 %v2871_v56, %s2652_s25 }
 0xa33   :  { %1189 = vperm.xlu0 %2630, %v2366_v57   ;;  %1184 = vperm.xlu1 %2631, %v2365_v58  }
 0xaa1   :  { %v1008_v59 = vpop.permute.xlu1 %1007  ;;  %v1003_v62 = vpop.permute.xlu0 %1002 }
 0xaa2   :  { %2543 = vmatprep.subr.msk.mxu1 %vm1006_vm5, %v1008_v59 }
 0xaa3   :  { %2544 = vmatpush3.msk.msra.mxu1 %vm1006_vm5, %v1008_v59 }
 0xaa4   :  { %2546 = vmatmul.mubr.msk.f32.vlgmr.msra.gmra.mrb[6].mxu1 %vm59_vm0, %v2358_v60  ;;  %2548 = vmatprep.subr.msk.mxu1 %vm1000_vm6, %v1003_v62 }
 0xaa5   :  { %2549 = vmatpush3.msk.msra.mxu1 %vm1000_vm6, %v1003_v62  ;;  %2550 = vmatprep.mubr.msk.f32.mxu1 %vm59_vm0, %v2355_v61 }
 0xaac   :  { %2551 = vmatmul.mubr.msk.f32.vlgmr.msra.gmra.mrb[6].mxu1 %vm59_vm0, %v2356_v63 }
 0xab2   :  { %v1190_v0 = vpop.permute.xlu0 %1189  ;;  %v1185_v2 = vpop.permute.xlu1 %1184 }
 0xb7f   :  { %v2552_v1 = vpop.f32.mrb[6].mxu1 }
 0xb80   :  { %v1193_v3 = vadd.f32 %v2552_v1, %v1190_v0  ;;  %v1170_v4 = vpop.f32.mrb[7].mxu1 }
 0xb81   :  { %v1192_v5 = vadd.f32 %v1185_v2, %v1170_v4  ;;  %v2390_v2 = vld [vmem:[%s3103_s4 + $0x48] sm:$0xff] }
 0xb83   :  { %v1194_v6 = vmul.f32 %v1193_v3, %v1192_v5  ;;  %v2397_v3 = vld [vmem:[%s3097_s2 + $0x50] sm:$0xff] }
 0xb85   :  { %1195 = vadd.xlane.f32.xlu1 %v1194_v6 }
 0xb96   :  { %1218 = vperm.xlu1 %2631, %v2368_v7  }
 0xb9a   :  { %1235 = vperm.xlu1 %2631, %v2372_v8  }
 0xc12   :  { %v1196_v10 = vpop.xlane.xlu1 %1195 }
 0xc13   :  { %v1197_v11 = vmul.f32 0.0078125, %v1196_v10  ;;  %v2406_v10 = vld [vmem:[%s3099_s3 + $0x58] sm:$0xff] }
 0xc15   :  { %v1198_v12 = vsub.f32 %v1194_v6, %v1197_v11  ;;  %v2405_v11 = vld [vmem:[%s3099_s3 + $0x50] sm:$0xff] }
 0xc16   :  { %v1219_v24 = vpop.permute.xlu1 %1218 }
 0xc17   :  { %v1199_v13 = vmul.f32 %v1198_v12, %v1198_v12 }
 0xc19   :  { %1200 = vadd.xlane.f32.xlu0 %v1199_v13  ;;  %v2398_v13 = vld [vmem:[%s3097_s2 + $0x58] sm:$0xff] }
 0xc1a   :  { %v1236_v28 = vpop.permute.xlu1 %1235 }
 0xc2f   :  { %1210 = vperm.xlu0 %2630, %v2367_v14   ;;  %v2395_v14 = vld [vmem:[%s3098_s1 + $0x50] sm:$0xff] }
 0xca6   :  { %v1201_v17 = vpop.xlane.xlu0 %1200 }
 0xca7   :  { %v1202_v18 = vmul.f32 0.0078125, %v1201_v17  ;;  %v2396_v17 = vld [vmem:[%s3098_s1 + $0x58] sm:$0xff] }
 0xca9   :  { %v1203_v19 = vadd.f32 1e-05, %v1202_v18 }
 0xcab   :  { %2638 = vrsqrt.f32 %v1203_v19 }
 0xcae   :  { %v1211_v22 = vpop.permute.xlu0 %1210 }
 0xcb5   :  { %v2639_v20 = vpop.eup %2638 }
 0xcb6   :  { %v1205_v21 = vmul.f32 %v2639_v20, %v1198_v12 }
 0xcb8   :  { %v1213_v23 = vmul.f32 %v1211_v22, %v1205_v21 }
 0xcba   :  { %v1221_v25 = vadd.f32 %v1219_v24, %v1213_v23 }
 0xcbc   :  { %2553 = vmatprep.subr.mxu0 %v1221_v25 }
 0xcbd   :  { %2554 = vmatpush3.msra.mxu0 %v1221_v25  ;;  %v2408_v25 = vld [vmem:[%s3102_s7 + $0x28] sm:$0xff] }
 0xcbe   :  { %2556 = vmatmul.mubr.msk.f32.vlgmr.msra.gmra.mrb[6].mxu0 %vm59_vm0, %v2370_v26  ;;  %v2412_v26 = vld [vmem:[%s3101_s5 + $0x58] sm:$0xff] }
 0xcbf   :  { %2560 = vmatprep.mubr.msk.f32.mxu0 %vm59_vm0, %v2377_v27 }
 0xd91   :  { %v2557_v29 = vpop.f32.mrb[6].mxu0 }
 0xd92   :  { %v1316_v30 = vadd.f32 %v2557_v29, %v1236_v28  ;;  %v2916_v31 = vpop.f32.mrb[7].mxu0 }
 0xd94   :  { %v2919_v32 = vadd.f32 %v1316_v30, %v2871_v56  ;;  %v2389_v56 = vld [vmem:[%s3103_s4 + $0x40] sm:$0xff] }
 0xd95   :  { %2570 = vmatprep.mubr.msk.f32.mxu1 %vm59_vm0, %v2389_v56  ;;  %v2415_v56 = vld [vmem:[%s3098_s1 + $0x60] sm:$0xff] }
 0xd96   :  { %1323 = vrot.lane.b32.xlu1 %v2919_v32, %s2653_s26  ;;  %1328 = vrot.lane.b32.xlu0 %v2919_v32, %s2654_s27 }
 0xd9a   :  { %1510 = vperm.xlu1 %2631, %v2386_v33   ;;  %1505 = vperm.xlu0 %2630, %v2385_v34   ;;  %v2409_v33 = vld [vmem:[%s3103_s4 + $0x50] sm:$0xff] }
 0xe08   :  { %v1329_v35 = vpop.permute.xlu0 %1328  ;;  %v1324_v38 = vpop.permute.xlu1 %1323 }
 0xe09   :  { %2558 = vmatprep.subr.msk.mxu0 %vm1327_vm7, %v1329_v35 }
 0xe0a   :  { %2559 = vmatpush3.msk.msra.mxu0 %vm1327_vm7, %v1329_v35 }
 0xe0b   :  { %2561 = vmatmul.mubr.msk.f32.vlgmr.msra.gmra.mrb[8].mxu0 %vm59_vm0, %v2378_v36  ;;  %2563 = vmatprep.subr.msk.mxu0 %vm1321_vm8, %v1324_v38 }
 0xe0c   :  { %2564 = vmatpush3.msk.msra.mxu0 %vm1321_vm8, %v1324_v38  ;;  %2565 = vmatprep.mubr.msk.f32.mxu0 %vm59_vm0, %v2375_v37 }
 0xe13   :  { %2566 = vmatmul.mubr.msk.f32.vlgmr.msra.gmra.mrb[8].mxu0 %vm59_vm0, %v2376_v39 }
 0xe14   :  { %2585 = vmatprep.mubr.msk.f32.mxu0 %vm59_vm0, %v2409_v33 }
 0xe19   :  { %v1511_v40 = vpop.permute.xlu1 %1510  ;;  %v1506_v43 = vpop.permute.xlu0 %1505 }
 0xee6   :  { %v2567_v42 = vpop.f32.mrb[8].mxu0 }
 0xee7   :  { %v1514_v44 = vadd.f32 %v2567_v42, %v1511_v40  ;;  %v1491_v45 = vpop.f32.mrb[9].mxu0 }
 0xee8   :  { %v1513_v46 = vadd.f32 %v1506_v43, %v1491_v45  ;;  %v2417_v45 = vld [vmem:[%s3097_s2 + $0x60] sm:$0xff] }
 0xeea   :  { %v1515_v47 = vmul.f32 %v1514_v44, %v1513_v46  ;;  %v2410_v44 = vld [vmem:[%s3103_s4 + $0x58] sm:$0xff] }
 0xeec   :  { %1516 = vadd.xlane.f32.xlu0 %v1515_v47 }
 0xf02   :  { %1531 = vperm.xlu0 %2630, %v2387_v48  }
 0xf06   :  { %1556 = vperm.xlu0 %2630, %v2392_v49  }
 0xf79   :  { %v1517_v50 = vpop.xlane.xlu0 %1516 }
 0xf7a   :  { %v1518_v51 = vmul.f32 0.0078125, %v1517_v50 }
 0xf7c   :  { %v1519_v52 = vsub.f32 %v1515_v47, %v1518_v51  ;;  %v2426_v51 = vld [vmem:[%s3099_s3 + $0x68] sm:$0xff] }
 0xf7e   :  { %v1520_v53 = vmul.f32 %v1519_v52, %v1519_v52 }
 0xf80   :  { %1521 = vadd.xlane.f32.xlu1 %v1520_v53 }
 0xf81   :  { %v1532_v62 = vpop.permute.xlu0 %1531 }
 0xf85   :  { %v1557_v4 = vpop.permute.xlu0 %1556 }
 0xf91   :  { %1539 = vperm.xlu1 %2631, %v2388_v54   ;;  %v2418_v54 = vld [vmem:[%s3097_s2 + $0x68] sm:$0xff] }
0x100d   :  { %v1522_v57 = vpop.xlane.xlu1 %1521 }
0x100e   :  { %v1523_v58 = vmul.f32 0.0078125, %v1522_v57 }
0x1010   :  { %v1524_v59 = vadd.f32 1e-05, %v1523_v58  ;;  %v2416_v58 = vld [vmem:[%s3098_s1 + $0x68] sm:$0xff] }
0x1011   :  { %v1540_v0 = vpop.permute.xlu1 %1539 }
0x1012   :  { %2640 = vrsqrt.f32 %v1524_v59 }
0x101c   :  { %v2641_v60 = vpop.eup %2640 }
0x101d   :  { %v1526_v61 = vmul.f32 %v2641_v60, %v1519_v52  ;;  %v2425_v52 = vld [vmem:[%s3099_s3 + $0x60] sm:$0xff] }
0x101f   :  { %v1534_v63 = vmul.f32 %v1532_v62, %v1526_v61 }
0x1021   :  { %v1542_v1 = vadd.f32 %v1540_v0, %v1534_v63 }
0x1023   :  { %2568 = vmatprep.subr.mxu1 %v1542_v1 }
0x1024   :  { %2569 = vmatpush3.msra.mxu1 %v1542_v1  ;;  %v2427_v1 = vld [vmem:[%s3100_s6 + $0x30] sm:$0xff] }
0x1025   :  { %2571 = vmatmul.mubr.msk.f32.vlgmr.msra.gmra.mrb[8].mxu1 %vm59_vm0, %v2390_v2  ;;  %v264_v2 = vld [vmem:[%s3101_s5] sm:$0xff] }
0x1026   :  { %2575 = vmatprep.mubr.msk.f32.mxu1 %vm59_vm0, %v2397_v3  ;;  %v2351_v3 = vld [vmem:[%s3101_s5 + $0x20] sm:$0xff] }
0x10f8   :  { %v2572_v5 = vpop.f32.mrb[8].mxu1 }
0x10f9   :  { %v1637_v6 = vadd.f32 %v2572_v5, %v1557_v4  ;;  %v2964_v7 = vpop.f32.mrb[9].mxu1  ;;  %v2391_v4 = vld [vmem:[%s3101_s5 + $0x40] sm:$0xff] }
0x10fa   :  { %v2431_v5 = vld [vmem:[%s3101_s5 + $0x60] sm:$0xff] }
0x10fb   :  { %v2967_v8 = vadd.f32 %v1637_v6, %v2919_v32  ;;  %v2407_v32 = vld [vmem:[%s3100_s6 + $0x28] sm:$0xff]  ;;  %v2284_v6 = vld [vmem:[%s3104_s8] sm:$0xff] }
0x10fd   :  { %1644 = vrot.lane.b32.xlu0 %v2967_v8, %s2655_s29  ;;  %1649 = vrot.lane.b32.xlu1 %v2967_v8, %s2656_s30 }
0x1101   :  { %1831 = vperm.xlu0 %2630, %v2406_v10   ;;  %1826 = vperm.xlu1 %2631, %v2405_v11  }
0x116f   :  { %v1650_v12 = vpop.permute.xlu1 %1649  ;;  %v1645_v15 = vpop.permute.xlu0 %1644 }
0x1170   :  { %2573 = vmatprep.subr.msk.mxu1 %vm1648_vm9, %v1650_v12 }
0x1171   :  { %2574 = vmatpush3.msk.msra.mxu1 %vm1648_vm9, %v1650_v12 }
0x1172   :  { %2576 = vmatmul.mubr.msk.f32.vlgmr.msra.gmra.mrb[10].mxu1 %vm59_vm0, %v2398_v13  ;;  %2578 = vmatprep.subr.msk.mxu1 %vm1642_vm10, %v1645_v15  ;;  %v2428_v13 = vld [vmem:[%s3102_s7 + $0x30] sm:$0xff] }
0x1173   :  { %2579 = vmatpush3.msk.msra.mxu1 %vm1642_vm10, %v1645_v15  ;;  %2580 = vmatprep.mubr.msk.f32.mxu1 %vm59_vm0, %v2395_v14  ;;  %v2331_v14 = vld [vmem:[%s3101_s5 + $0x10] sm:$0xff] }
0x1174   :  { %v2371_v15 = vld [vmem:[%s3101_s5 + $0x30] sm:$0xff] }
0x117a   :  { %2581 = vmatmul.mubr.msk.f32.vlgmr.msra.gmra.mrb[10].mxu1 %vm59_vm0, %v2396_v17  ;;  %v2411_v17 = vld [vmem:[%s3101_s5 + $0x50] sm:$0xff] }
0x1180   :  { %v1832_v18 = vpop.permute.xlu0 %1831  ;;  %v1827_v20 = vpop.permute.xlu1 %1826 }
0x124d   :  { %v2582_v19 = vpop.f32.mrb[10].mxu1 }
0x124e   :  { %v1835_v21 = vadd.f32 %v2582_v19, %v1832_v18  ;;  %v1812_v22 = vpop.f32.mrb[11].mxu1  ;;  %v2432_v18 = vld [vmem:[%s3101_s5 + $0x68] sm:$0xff] }
0x124f   :  { %v1834_v23 = vadd.f32 %v1827_v20, %v1812_v22  ;;  %v2292_v19 = vld [vmem:[%s3104_s8 + $0x8] sm:$0xff]  ;;  %v2429_v20 = vld [vmem:[%s3103_s4 + $0x60] sm:$0xff] }
0x1250   :  { %2600 = vmatprep.mubr.msk.f32.mxu1 %vm59_vm0, %v2429_v20 }
0x1251   :  { %v1836_v24 = vmul.f32 %v1835_v21, %v1834_v23 }
0x1253   :  { %1837 = vadd.xlane.f32.xlu1 %v1836_v24 }
0x1264   :  { %1860 = vperm.xlu1 %2631, %v2408_v25  }
0x1268   :  { %1877 = vperm.xlu1 %2631, %v2412_v26  }
0x12e0   :  { %v1838_v27 = vpop.xlane.xlu1 %1837 }
0x12e1   :  { %v1839_v28 = vmul.f32 0.0078125, %v1838_v27 }
0x12e3   :  { %v1840_v29 = vsub.f32 %v1836_v24, %v1839_v28 }
0x12e4   :  { %v1861_v42 = vpop.permute.xlu1 %1860 }
0x12e5   :  { %v1841_v30 = vmul.f32 %v1840_v29, %v1840_v29 }
0x12e7   :  { %1842 = vadd.xlane.f32.xlu0 %v1841_v30 }
0x12e8   :  { %v1878_v46 = vpop.permute.xlu1 %1877 }
0x12fd   :  { %1852 = vperm.xlu0 %2630, %v2407_v32  }
0x1374   :  { %v1843_v34 = vpop.xlane.xlu0 %1842 }
0x1375   :  { %v1844_v35 = vmul.f32 0.0078125, %v1843_v34 }
0x1377   :  { %v1845_v36 = vadd.f32 1e-05, %v1844_v35 }
0x1379   :  { %2642 = vrsqrt.f32 %v1845_v36 }
0x137c   :  { %v1853_v39 = vpop.permute.xlu0 %1852 }
0x1383   :  { %v2643_v37 = vpop.eup %2642 }
0x1384   :  { %v1847_v38 = vmul.f32 %v2643_v37, %v1840_v29 }
0x1386   :  { %v1855_v40 = vmul.f32 %v1853_v39, %v1847_v38 }
0x1388   :  { %v1863_v43 = vadd.f32 %v1861_v42, %v1855_v40 }
0x138a   :  { %2583 = vmatprep.subr.mxu0 %v1863_v43 }
0x138b   :  { %2584 = vmatpush3.msra.mxu0 %v1863_v43 }
0x138c   :  { %2586 = vmatmul.mubr.msk.f32.vlgmr.msra.gmra.mrb[10].mxu0 %vm59_vm0, %v2410_v44 }
0x138d   :  { %2590 = vmatprep.mubr.msk.f32.mxu0 %vm59_vm0, %v2417_v45 }
0x145f   :  { %v2587_v47 = vpop.f32.mrb[10].mxu0 }
0x1460   :  { %v1958_v48 = vadd.f32 %v2587_v47, %v1878_v46  ;;  %v3012_v49 = vpop.f32.mrb[11].mxu0 }
0x1462   :  { %v3015_v50 = vadd.f32 %v1958_v48, %v2967_v8 }
0x1464   :  { %1965 = vrot.lane.b32.xlu1 %v3015_v50, %s2657_s12  ;;  %1970 = vrot.lane.b32.xlu0 %v3015_v50, %s2658_s13 }
0x1468   :  { %2152 = vperm.xlu1 %2631, %v2426_v51   ;;  %2147 = vperm.xlu0 %2630, %v2425_v52  }
0x14d6   :  { %v1971_v53 = vpop.permute.xlu0 %1970  ;;  %v1966_v57 = vpop.permute.xlu1 %1965 }
0x14d7   :  { %2588 = vmatprep.subr.msk.mxu0 %vm1969_vm11, %v1971_v53 }
0x14d8   :  { %2589 = vmatpush3.msk.msra.mxu0 %vm1969_vm11, %v1971_v53 }
0x14d9   :  { %2591 = vmatmul.mubr.msk.f32.vlgmr.msra.gmra.mrb[12].mxu0 %vm59_vm0, %v2418_v54  ;;  %2593 = vmatprep.subr.msk.mxu0 %vm1963_vm12, %v1966_v57 }
0x14da   :  { %2594 = vmatpush3.msk.msra.mxu0 %vm1963_vm12, %v1966_v57  ;;  %2595 = vmatprep.mubr.msk.f32.mxu0 %vm59_vm0, %v2415_v56 }
0x14e1   :  { %2596 = vmatmul.mubr.msk.f32.vlgmr.msra.gmra.mrb[12].mxu0 %vm59_vm0, %v2416_v58 }
0x14e7   :  { %v2153_v9 = vpop.permute.xlu1 %2152  ;;  %v2148_v60 = vpop.permute.xlu0 %2147 }
0x15b4   :  { %v2597_v59 = vpop.f32.mrb[12].mxu0 }
0x15b5   :  { %v2156_v61 = vadd.f32 %v2597_v59, %v2153_v9  ;;  %v2133_v62 = vpop.f32.mrb[13].mxu0 }
0x15b6   :  { %v2155_v63 = vadd.f32 %v2148_v60, %v2133_v62 }
0x15b8   :  { %v2157_v0 = vmul.f32 %v2156_v61, %v2155_v63 }
0x15ba   :  { %2158 = vadd.xlane.f32.xlu0 %v2157_v0 }
0x15d0   :  { %2173 = vperm.xlu0 %2630, %v2427_v1  }
0x15d4   :  { %268 = vperm.xlu0 %2630, %v264_v2  }
0x15d8   :  { %909 = vperm.xlu0 %2630, %v2351_v3  }
0x15dc   :  { %1551 = vperm.xlu0 %2630, %v2391_v4  }
0x15e0   :  { %2193 = vperm.xlu0 %2630, %v2431_v5  }
0x15e4   :  { %2287 = vperm.xlu0 %2630, %v2284_v6  }
0x1647   :  { %v2159_v8 = vpop.xlane.xlu0 %2158 }
0x1648   :  { %v2160_v10 = vmul.f32 0.0078125, %v2159_v8 }
0x164a   :  { %v2161_v11 = vsub.f32 %v2157_v0, %v2160_v10 }
0x164c   :  { %v2162_v12 = vmul.f32 %v2161_v11, %v2161_v11 }
0x164e   :  { %2163 = vadd.xlane.f32.xlu1 %v2162_v12 }
0x164f   :  { %v2174_v21 = vpop.permute.xlu0 %2173 }
0x1653   :  { %v269_v22 = vpop.permute.xlu0 %268 }
0x1654   :  { %v349_v29 = vadd.f32 %v2773_v41, %v269_v22 }
0x1657   :  { %v910_v27 = vpop.permute.xlu0 %909 }
0x1658   :  { %v990_v32 = vadd.f32 %v2868_v55, %v910_v27  ;;  %v2430_v55 = vld [vmem:[%s3103_s4 + $0x68] sm:$0xff] }
0x165b   :  { %v1552_v34 = vpop.permute.xlu0 %1551 }
0x165c   :  { %v1632_v39 = vadd.f32 %v2964_v7, %v1552_v34 }
0x165f   :  { %2181 = vperm.xlu1 %2631, %v2428_v13   ;;  %v2194_v47 = vpop.permute.xlu0 %2193 }
0x1663   :  { %588 = vperm.xlu1 %2631, %v2331_v14   ;;  %v2288_v56 = vpop.permute.xlu0 %2287 }
0x1667   :  { %1230 = vperm.xlu1 %2631, %v2371_v15  }
0x166b   :  { %1872 = vperm.xlu1 %2631, %v2411_v17  }
0x166f   :  { %2198 = vperm.xlu1 %2631, %v2432_v18  }
0x1673   :  { %2295 = vperm.xlu1 %2631, %v2292_v19  }
0x16db   :  { %v2164_v23 = vpop.xlane.xlu1 %2163 }
0x16dc   :  { %v2165_v24 = vmul.f32 0.0078125, %v2164_v23 }
0x16de   :  { %v2166_v25 = vadd.f32 1e-05, %v2165_v24 }
0x16df   :  { %v2182_v26 = vpop.permute.xlu1 %2181 }
0x16e0   :  { %2644 = vrsqrt.f32 %v2166_v25 }
0x16e3   :  { %v589_v28 = vpop.permute.xlu1 %588 }
0x16e4   :  { %v669_v30 = vadd.f32 %v2821_v16, %v589_v28 }
0x16e6   :  { %v677_v33 = vadd.f32 %v669_v30, %v349_v29 }
0x16e7   :  { %v1231_v35 = vpop.permute.xlu1 %1230 }
0x16e8   :  { %v998_v36 = vadd.f32 %v990_v32, %v677_v33  ;;  %v1311_v37 = vadd.f32 %v2916_v31, %v1231_v35 }
0x16ea   :  { %v2645_v38 = vpop.eup %2644  ;;  %v1319_v40 = vadd.f32 %v1311_v37, %v998_v36 }
0x16eb   :  { %v2168_v42 = vmul.f32 %v2645_v38, %v2161_v11  ;;  %v1873_v43 = vpop.permute.xlu1 %1872 }
0x16ec   :  { %v1640_v44 = vadd.f32 %v1632_v39, %v1319_v40  ;;  %v1953_v45 = vadd.f32 %v3012_v49, %v1873_v43 }
0x16ed   :  { %v2176_v41 = vmul.f32 %v2174_v21, %v2168_v42 }
0x16ee   :  { %v1961_v46 = vadd.f32 %v1953_v45, %v1640_v44 }
0x16ef   :  { %v2184_v16 = vadd.f32 %v2182_v26, %v2176_v41  ;;  %v2199_v31 = vpop.permute.xlu1 %2198 }
0x16f1   :  { %2598 = vmatprep.subr.mxu1 %v2184_v16 }
0x16f2   :  { %2599 = vmatpush3.msra.mxu1 %v2184_v16 }
0x16f3   :  { %2601 = vmatmul.mubr.msk.f32.vlgmr.msra.gmra.mrb[12].mxu1 %vm59_vm0, %v2430_v55  ;;  %v2296_v49 = vpop.permute.xlu1 %2295 }
0x17c6   :  { %v2602_v7 = vpop.f32.mrb[12].mxu1 }
0x17c7   :  { %v2279_v48 = vadd.f32 %v2602_v7, %v2199_v31  ;;  %v2273_v51 = vpop.f32.mrb[13].mxu1 }
0x17c8   :  { %v2274_v52 = vadd.f32 %v2273_v51, %v2194_v47 }
0x17c9   :  { %v2283_v53 = vadd.f32 %v2279_v48, %v3015_v50 }
0x17ca   :  { %v2282_v54 = vadd.f32 %v2274_v52, %v1961_v46 }
0x17cb   :  { %v2298_v57 = vadd.f32 %v2296_v49, %v2283_v53 }
0x17cc   :  { %v2290_v58 = vadd.f32 %v2288_v56, %v2282_v54 }
0x17cd   :  { %2299 = vst [vmem:[%s3105_s9] sm:$0xff] %v2298_v57 }
0x17ce   :  { %2291 = vst [vmem:[%s3106_s10] sm:$0xff] %v2290_v58 }

</bundles_post_ra>
